<compile_context>
chip_gen: v7x
topology: tpu7x:2x2x1
jax: 0.10.0
libtpu: 0.0.40
codegen_flags: <defaults>
</compile_context>

<pallas_src>
import numpy as np

import jax
import jax.numpy as jnp
from jax import lax
from jax.experimental import pallas as pl
from jax.experimental.pallas import tpu as pltpu


# ------------------------------ Pallas kernel --------------------------------

def _fused_convnet_kernel(x1_ref, g2_ref, g3_ref, g4_ref,
                          w1_ref, w2_ref, w3_ref, w4_ref, b_ref,
                          out_ref, col_ref):
    """Four conv(3x3,s2,p1)+ReLU layers; inter-layer activations stay in VMEM.

    x1_ref : (K1p, M1)          externally im2col'd layer-1 input (K zero-padded)
    g2_ref : (9, M1, M2) bf16   per-tap 0/1 gather matrices (layer 2)
    g3_ref : (9, M2, M3) f32    per-tap 0/1 gather matrices (layer 3)
    g4_ref : (9, M3, M4) f32    per-tap 0/1 gather matrices (layer 4)
    w1_ref : (Cout, K1p)        stacked layer-1 weights
    wL_ref : (Cout, 9*Cout)     stacked layer-L weights, L = 2..4
    b_ref  : (4, Cout, 1)       per-layer biases
    out_ref: (Cout, M4)         transposed final activations
    col_ref: (9*Cout, M2) f32   scratch holding the stacked gathered slab
    """
    # ---- Layer 1: im2col already done outside -> one stacked-K matmul. ----
    a = jnp.dot(w1_ref[...], x1_ref[...], preferred_element_type=jnp.float32)
    a = jnp.maximum(a + b_ref[0], 0.0)                        # (Cout, M1)

    # ---- Layers 2..4: 9 gather matmuls -> (9*Cin, M_out) scratch, then one
    #      K=288 weight matmul per layer. ----
    layers = ((g2_ref, w2_ref), (g3_ref, w3_ref), (g4_ref, w4_ref))
    for l, (g_ref, w_ref) in enumerate(layers):
        cin = a.shape[0]
        m_out = g_ref.shape[2]
        for t in range(9):                                    # static unroll
            gathered = jnp.dot(a, g_ref[t].astype(jnp.float32),
                               preferred_element_type=jnp.float32)
            col_ref[t * cin:(t + 1) * cin, :m_out] = gathered
        z = jnp.dot(w_ref[...], col_ref[:, :m_out],
                    preferred_element_type=jnp.float32)
        a = jnp.maximum(z + b_ref[l + 1], 0.0)                # (Cout, M_L)

    out_ref[...] = a.astype(out_ref.dtype)


# -------------------------- Host-side constant build --------------------------

def _gather_mats(n, h, w):
    """0/1 matrices G_t^T (R_in, M_out) selecting tap t of a 3x3/s2/p1 conv."""
    ho, wo = (h + 1) // 2, (w + 1) // 2
    g = np.zeros((9, n * h * w, n * ho * wo), np.float32)
    for b in range(n):
        for oh in range(ho):
            for ow in range(wo):
                m = (b * ho + oh) * wo + ow
                for i in range(3):
                    for j in range(3):
                        hh, ww = 2 * oh + i - 1, 2 * ow + j - 1
                        if 0 <= hh < h and 0 <= ww < w:
                            g[3 * i + j, (b * h + hh) * w + ww, m] = 1.0
    return g, ho, wo


def _stack_weight(wt):
    """(Cout, Cin, 3, 3) -> (Cout, 9*Cin) with column index t*Cin + ci, t=3i+j."""
    co, ci = wt.shape[0], wt.shape[1]
    per_tap = jnp.transpose(wt, (2, 3, 0, 1)).reshape(9, co, ci)   # [t, co, ci]
    return jnp.transpose(per_tap, (1, 0, 2)).reshape(co, 9 * ci)


def build_feature_extractor(params, x_shape):
    """Precompute packed weights / gather matrices, return a jitted forward."""
    n, c0, h0, w0 = x_shape
    assert len(params) == 4
    cout = params[0][0].shape[0]

    # Spatial sizes per stage (conv 3x3, stride 2, pad 1 => ceil(h/2)).
    hs, ws = [h0], [w0]
    for _ in range(4):
        hs.append((hs[-1] + 1) // 2)
        ws.append((ws[-1] + 1) // 2)
    ms = [n * hs[i] * ws[i] for i in range(5)]     # pixel counts per stage
    h1, w1 = hs[1], ws[1]
    hf, wf = hs[4], ws[4]

    # ---- Packed weights / biases (built once; no per-call reshapes). ----
    k1 = 9 * c0
    k1_pad = -(-k1 // 8) * 8                       # sublane-aligned stacked K
    w1s = jnp.pad(_stack_weight(params[0][0]), ((0, 0), (0, k1_pad - k1)))
    w2s = _stack_weight(params[1][0])
    w3s = _stack_weight(params[2][0])
    w4s = _stack_weight(params[3][0])
    b_pack = jnp.stack([jnp.reshape(b, (cout, 1)) for (_, b) in params], 0)

    # ---- 0/1 gather matrices for layers 2..4 only (layer 1 is external). ----
    g2_np, _, _ = _gather_mats(n, hs[1], ws[1])
    g3_np, _, _ = _gather_mats(n, hs[2], ws[2])
    g4_np, _, _ = _gather_mats(n, hs[3], ws[3])
    g2 = jnp.asarray(g2_np, dtype=jnp.bfloat16)    # 0/1 exact in bf16, half DMA
    g3 = jnp.asarray(g3_np, dtype=jnp.float32)     # tiny; keep f32
    g4 = jnp.asarray(g4_np, dtype=jnp.float32)

    vmem = pl.BlockSpec(memory_space=pltpu.MemorySpace.VMEM)
    fused = pl.pallas_call(
        _fused_convnet_kernel,
        out_shape=jax.ShapeDtypeStruct((cout, ms[4]), jnp.float32),
        in_specs=[vmem] * 9,
        out_specs=vmem,
        scratch_shapes=[pltpu.VMEM((9 * cout, ms[2]), jnp.float32)],
    )

    @jax.jit
    def forward(x_nchw):
        # External im2col of the raw input: 9 strided slices of the padded
        # image, stacked so rows are t*C0 + ci and columns (b*H1 + oh)*W1 + ow.
        xp = jnp.pad(x_nchw, ((0, 0), (0, 0), (1, 1), (1, 1)))
        taps = [xp[:, :, i:i + 2 * h1 - 1:2, j:j + 2 * w1 - 1:2]
                for i in range(3) for j in range(3)]       # 9 x (N, C0, H1, W1)
        x1 = jnp.stack(taps, 0)                             # (9, N, C0, H1, W1)
        x1 = jnp.transpose(x1, (0, 2, 1, 3, 4)).reshape(k1, ms[1])
        x1 = jnp.pad(x1, ((0, k1_pad - k1), (0, 0)))        # (K1p, M1)

        out_t = fused(x1, g2, g3, g4, w1s, w2s, w3s, w4s, b_pack)
        # (Cout, N*Hf*Wf) -> NCHW flatten, identical to torch.nn.Flatten.
        return jnp.transpose(out_t.reshape(cout, n, hf, wf),
                             (1, 0, 2, 3)).reshape(n, -1)

    return forward


# ------------------------------ Parameters ------------------------------------

def init_params(input_channels=4, seed=0):
    """Deterministic synthetic parameters matching the PyTorch module shapes."""
    key = jax.random.PRNGKey(seed)
    channels = [input_channels, 32, 32, 32, 32]
    params = []
    for li in range(4):
        cin, cout = channels[li], channels[li + 1]
        key, kw, kb = jax.random.split(key, 3)
        fan_in = cin * 3 * 3
        bound = 1.0 / jnp.sqrt(fan_in)
        w = jax.random.uniform(kw, (cout, cin, 3, 3), jnp.float32, -bound, bound)
        b = jax.random.uniform(kb, (cout,), jnp.float32, -bound, bound)
        params.append((w, b))
    return params


# --------------------------- Pure-JAX reference -------------------------------

def _reference(x_nchw, params):
    h = x_nchw
    for (w, b) in params:
        h = lax.conv_general_dilated(
            h, w, window_strides=(2, 2), padding=((1, 1), (1, 1)),
            dimension_numbers=("NCHW", "OIHW", "NCHW"))
        h = jnp.maximum(h + b[None, :, None, None], 0.0)
    return h.reshape(h.shape[0], -1)


# ----------------------------------- Main -------------------------------------

if __name__ == "__main__":
    key = jax.random.PRNGKey(0)
    x = jax.random.normal(key, (2, 4, 16, 16), jnp.float32)   # NCHW
    params = init_params(input_channels=4, seed=0)

    forward = build_feature_extractor(params, x.shape)
    out = jax.block_until_ready(forward(x))

    ref = _reference(x, params)
    assert out.shape == (2, 32), out.shape
    err = float(jnp.max(jnp.abs(out - ref)))
    assert jnp.allclose(out, ref, atol=1e-3, rtol=1e-3), f"mismatch vs ref: {err}"

    print("KERNEL_OK")
</pallas_src>

<mosaic_0001>
module attributes {stable_mosaic.version = 11 : i64} {
  func.func @_fused_convnet_kernel(%arg0: memref<40x128xf32, #tpu.memory_space<vmem>>, %arg1: memref<9x128x32xbf16, #tpu.memory_space<vmem>>, %arg2: memref<9x32x8xf32, #tpu.memory_space<vmem>>, %arg3: memref<9x8x2xf32, #tpu.memory_space<vmem>>, %arg4: memref<32x40xf32, #tpu.memory_space<vmem>>, %arg5: memref<32x288xf32, #tpu.memory_space<vmem>>, %arg6: memref<32x288xf32, #tpu.memory_space<vmem>>, %arg7: memref<32x288xf32, #tpu.memory_space<vmem>>, %arg8: memref<4x32x1xf32, #tpu.memory_space<vmem>>, %arg9: memref<32x2xf32, #tpu.memory_space<vmem>>, %arg10: memref<288x32xf32, #tpu.memory_space<vmem>>) attributes {dimension_semantics = [], scalar_prefetch = 0 : i64, scratch_operands = 1 : i64, tpu.core_type = #tpu.core_type<tc>} {
    %c0 = arith.constant 0 : index
    %c0_0 = arith.constant 0 : index
    %0 = vector.load %arg4[%c0, %c0_0] : memref<32x40xf32, #tpu.memory_space<vmem>>, vector<32x40xf32>
    %c0_1 = arith.constant 0 : index
    %c0_2 = arith.constant 0 : index
    %1 = vector.load %arg0[%c0_1, %c0_2] : memref<40x128xf32, #tpu.memory_space<vmem>>, vector<40x128xf32>
    %cst = arith.constant dense<0.000000e+00> : vector<32x128xf32>
    %2 = tpu.matmul %0, %1, %cst {dimension_numbers = #tpu.dot_dimension_numbers<[1], [0], [0], [1], [0, 0, 1, 1], [], []>} : vector<32x40xf32>, vector<40x128xf32>, vector<32x128xf32> -> vector<32x128xf32>
    %c0_3 = arith.constant 0 : index
    %c0_4 = arith.constant 0 : index
    %c0_5 = arith.constant 0 : index
    %3 = vector.load %arg8[%c0_3, %c0_4, %c0_5] : memref<4x32x1xf32, #tpu.memory_space<vmem>>, vector<1x32x1xf32>
    %4 = vector.shape_cast %3 : vector<1x32x1xf32> to vector<32x1xf32>
    %5 = vector.broadcast %4 : vector<32x1xf32> to vector<32x128xf32>
    %6 = arith.addf %2, %5 : vector<32x128xf32>
    %cst_6 = arith.constant 0.000000e+00 : f32
    %7 = vector.broadcast %cst_6 : f32 to vector<32x128xf32>
    %8 = arith.maximumf %6, %7 : vector<32x128xf32>
    %c0_7 = arith.constant 0 : index
    %c0_8 = arith.constant 0 : index
    %c0_9 = arith.constant 0 : index
    %9 = vector.load %arg1[%c0_7, %c0_8, %c0_9] : memref<9x128x32xbf16, #tpu.memory_space<vmem>>, vector<1x128x32xbf16>
    %10 = vector.shape_cast %9 : vector<1x128x32xbf16> to vector<128x32xbf16>
    %11 = arith.extf %10 : vector<128x32xbf16> to vector<128x32xf32>
    %cst_10 = arith.constant dense<0.000000e+00> : vector<32x32xf32>
    %12 = tpu.matmul %8, %11, %cst_10 {dimension_numbers = #tpu.dot_dimension_numbers<[1], [0], [0], [1], [0, 0, 1, 1], [], []>} : vector<32x128xf32>, vector<128x32xf32>, vector<32x32xf32> -> vector<32x32xf32>
    %c0_11 = arith.constant 0 : index
    %c0_12 = arith.constant 0 : index
    %13 = vector.load %arg10[%c0_11, %c0_12] : memref<288x32xf32, #tpu.memory_space<vmem>>, vector<32x32xf32>
    tpu.vector_store %arg10[%c0_11, %c0_12], %12 {strides = array<i32>} : memref<288x32xf32, #tpu.memory_space<vmem>>, vector<32x32xf32>,
    %c1 = arith.constant 1 : index
    %c0_13 = arith.constant 0 : index
    %c0_14 = arith.constant 0 : index
    %14 = vector.load %arg1[%c1, %c0_13, %c0_14] : memref<9x128x32xbf16, #tpu.memory_space<vmem>>, vector<1x128x32xbf16>
    %15 = vector.shape_cast %14 : vector<1x128x32xbf16> to vector<128x32xbf16>
    %16 = arith.extf %15 : vector<128x32xbf16> to vector<128x32xf32>
    %cst_15 = arith.constant dense<0.000000e+00> : vector<32x32xf32>
    %17 = tpu.matmul %8, %16, %cst_15 {dimension_numbers = #tpu.dot_dimension_numbers<[1], [0], [0], [1], [0, 0, 1, 1], [], []>} : vector<32x128xf32>, vector<128x32xf32>, vector<32x32xf32> -> vector<32x32xf32>
    %c32 = arith.constant 32 : index
    %c0_16 = arith.constant 0 : index
    %18 = vector.load %arg10[%c32, %c0_16] : memref<288x32xf32, #tpu.memory_space<vmem>>, vector<32x32xf32>
    tpu.vector_store %arg10[%c32, %c0_16], %17 {strides = array<i32>} : memref<288x32xf32, #tpu.memory_space<vmem>>, vector<32x32xf32>,
    %c2 = arith.constant 2 : index
    %c0_17 = arith.constant 0 : index
    %c0_18 = arith.constant 0 : index
    %19 = vector.load %arg1[%c2, %c0_17, %c0_18] : memref<9x128x32xbf16, #tpu.memory_space<vmem>>, vector<1x128x32xbf16>
    %20 = vector.shape_cast %19 : vector<1x128x32xbf16> to vector<128x32xbf16>
    %21 = arith.extf %20 : vector<128x32xbf16> to vector<128x32xf32>
    %cst_19 = arith.constant dense<0.000000e+00> : vector<32x32xf32>
    %22 = tpu.matmul %8, %21, %cst_19 {dimension_numbers = #tpu.dot_dimension_numbers<[1], [0], [0], [1], [0, 0, 1, 1], [], []>} : vector<32x128xf32>, vector<128x32xf32>, vector<32x32xf32> -> vector<32x32xf32>
    %c64 = arith.constant 64 : index
    %c0_20 = arith.constant 0 : index
    %23 = vector.load %arg10[%c64, %c0_20] : memref<288x32xf32, #tpu.memory_space<vmem>>, vector<32x32xf32>
    tpu.vector_store %arg10[%c64, %c0_20], %22 {strides = array<i32>} : memref<288x32xf32, #tpu.memory_space<vmem>>, vector<32x32xf32>,
    %c3 = arith.constant 3 : index
    %c0_21 = arith.constant 0 : index
    %c0_22 = arith.constant 0 : index
    %24 = vector.load %arg1[%c3, %c0_21, %c0_22] : memref<9x128x32xbf16, #tpu.memory_space<vmem>>, vector<1x128x32xbf16>
    %25 = vector.shape_cast %24 : vector<1x128x32xbf16> to vector<128x32xbf16>
    %26 = arith.extf %25 : vector<128x32xbf16> to vector<128x32xf32>
    %cst_23 = arith.constant dense<0.000000e+00> : vector<32x32xf32>
    %27 = tpu.matmul %8, %26, %cst_23 {dimension_numbers = #tpu.dot_dimension_numbers<[1], [0], [0], [1], [0, 0, 1, 1], [], []>} : vector<32x128xf32>, vector<128x32xf32>, vector<32x32xf32> -> vector<32x32xf32>
    %c96 = arith.constant 96 : index
    %c0_24 = arith.constant 0 : index
    %28 = vector.load %arg10[%c96, %c0_24] : memref<288x32xf32, #tpu.memory_space<vmem>>, vector<32x32xf32>
    tpu.vector_store %arg10[%c96, %c0_24], %27 {strides = array<i32>} : memref<288x32xf32, #tpu.memory_space<vmem>>, vector<32x32xf32>,
    %c4 = arith.constant 4 : index
    %c0_25 = arith.constant 0 : index
    %c0_26 = arith.constant 0 : index
    %29 = vector.load %arg1[%c4, %c0_25, %c0_26] : memref<9x128x32xbf16, #tpu.memory_space<vmem>>, vector<1x128x32xbf16>
    %30 = vector.shape_cast %29 : vector<1x128x32xbf16> to vector<128x32xbf16>
    %31 = arith.extf %30 : vector<128x32xbf16> to vector<128x32xf32>
    %cst_27 = arith.constant dense<0.000000e+00> : vector<32x32xf32>
    %32 = tpu.matmul %8, %31, %cst_27 {dimension_numbers = #tpu.dot_dimension_numbers<[1], [0], [0], [1], [0, 0, 1, 1], [], []>} : vector<32x128xf32>, vector<128x32xf32>, vector<32x32xf32> -> vector<32x32xf32>
    %c128 = arith.constant 128 : index
    %c0_28 = arith.constant 0 : index
    %33 = vector.load %arg10[%c128, %c0_28] : memref<288x32xf32, #tpu.memory_space<vmem>>, vector<32x32xf32>
    tpu.vector_store %arg10[%c128, %c0_28], %32 {strides = array<i32>} : memref<288x32xf32, #tpu.memory_space<vmem>>, vector<32x32xf32>,
    %c5 = arith.constant 5 : index
    %c0_29 = arith.constant 0 : index
    %c0_30 = arith.constant 0 : index
    %34 = vector.load %arg1[%c5, %c0_29, %c0_30] : memref<9x128x32xbf16, #tpu.memory_space<vmem>>, vector<1x128x32xbf16>
    %35 = vector.shape_cast %34 : vector<1x128x32xbf16> to vector<128x32xbf16>
    %36 = arith.extf %35 : vector<128x32xbf16> to vector<128x32xf32>
    %cst_31 = arith.constant dense<0.000000e+00> : vector<32x32xf32>
    %37 = tpu.matmul %8, %36, %cst_31 {dimension_numbers = #tpu.dot_dimension_numbers<[1], [0], [0], [1], [0, 0, 1, 1], [], []>} : vector<32x128xf32>, vector<128x32xf32>, vector<32x32xf32> -> vector<32x32xf32>
    %c160 = arith.constant 160 : index
    %c0_32 = arith.constant 0 : index
    %38 = vector.load %arg10[%c160, %c0_32] : memref<288x32xf32, #tpu.memory_space<vmem>>, vector<32x32xf32>
    tpu.vector_store %arg10[%c160, %c0_32], %37 {strides = array<i32>} : memref<288x32xf32, #tpu.memory_space<vmem>>, vector<32x32xf32>,
    %c6 = arith.constant 6 : index
    %c0_33 = arith.constant 0 : index
    %c0_34 = arith.constant 0 : index
    %39 = vector.load %arg1[%c6, %c0_33, %c0_34] : memref<9x128x32xbf16, #tpu.memory_space<vmem>>, vector<1x128x32xbf16>
    %40 = vector.shape_cast %39 : vector<1x128x32xbf16> to vector<128x32xbf16>
    %41 = arith.extf %40 : vector<128x32xbf16> to vector<128x32xf32>
    %cst_35 = arith.constant dense<0.000000e+00> : vector<32x32xf32>
    %42 = tpu.matmul %8, %41, %cst_35 {dimension_numbers = #tpu.dot_dimension_numbers<[1], [0], [0], [1], [0, 0, 1, 1], [], []>} : vector<32x128xf32>, vector<128x32xf32>, vector<32x32xf32> -> vector<32x32xf32>
    %c192 = arith.constant 192 : index
    %c0_36 = arith.constant 0 : index
    %43 = vector.load %arg10[%c192, %c0_36] : memref<288x32xf32, #tpu.memory_space<vmem>>, vector<32x32xf32>
    tpu.vector_store %arg10[%c192, %c0_36], %42 {strides = array<i32>} : memref<288x32xf32, #tpu.memory_space<vmem>>, vector<32x32xf32>,
    %c7 = arith.constant 7 : index
    %c0_37 = arith.constant 0 : index
    %c0_38 = arith.constant 0 : index
    %44 = vector.load %arg1[%c7, %c0_37, %c0_38] : memref<9x128x32xbf16, #tpu.memory_space<vmem>>, vector<1x128x32xbf16>
    %45 = vector.shape_cast %44 : vector<1x128x32xbf16> to vector<128x32xbf16>
    %46 = arith.extf %45 : vector<128x32xbf16> to vector<128x32xf32>
    %cst_39 = arith.constant dense<0.000000e+00> : vector<32x32xf32>
    %47 = tpu.matmul %8, %46, %cst_39 {dimension_numbers = #tpu.dot_dimension_numbers<[1], [0], [0], [1], [0, 0, 1, 1], [], []>} : vector<32x128xf32>, vector<128x32xf32>, vector<32x32xf32> -> vector<32x32xf32>
    %c224 = arith.constant 224 : index
    %c0_40 = arith.constant 0 : index
    %48 = vector.load %arg10[%c224, %c0_40] : memref<288x32xf32, #tpu.memory_space<vmem>>, vector<32x32xf32>
    tpu.vector_store %arg10[%c224, %c0_40], %47 {strides = array<i32>} : memref<288x32xf32, #tpu.memory_space<vmem>>, vector<32x32xf32>,
    %c8 = arith.constant 8 : index
    %c0_41 = arith.constant 0 : index
    %c0_42 = arith.constant 0 : index
    %49 = vector.load %arg1[%c8, %c0_41, %c0_42] : memref<9x128x32xbf16, #tpu.memory_space<vmem>>, vector<1x128x32xbf16>
    %50 = vector.shape_cast %49 : vector<1x128x32xbf16> to vector<128x32xbf16>
    %51 = arith.extf %50 : vector<128x32xbf16> to vector<128x32xf32>
    %cst_43 = arith.constant dense<0.000000e+00> : vector<32x32xf32>
    %52 = tpu.matmul %8, %51, %cst_43 {dimension_numbers = #tpu.dot_dimension_numbers<[1], [0], [0], [1], [0, 0, 1, 1], [], []>} : vector<32x128xf32>, vector<128x32xf32>, vector<32x32xf32> -> vector<32x32xf32>
    %c256 = arith.constant 256 : index
    %c0_44 = arith.constant 0 : index
    %53 = vector.load %arg10[%c256, %c0_44] : memref<288x32xf32, #tpu.memory_space<vmem>>, vector<32x32xf32>
    tpu.vector_store %arg10[%c256, %c0_44], %52 {strides = array<i32>} : memref<288x32xf32, #tpu.memory_space<vmem>>, vector<32x32xf32>,
    %c0_45 = arith.constant 0 : index
    %c0_46 = arith.constant 0 : index
    %54 = vector.load %arg5[%c0_45, %c0_46] : memref<32x288xf32, #tpu.memory_space<vmem>>, vector<32x288xf32>
    %c0_47 = arith.constant 0 : index
    %c0_48 = arith.constant 0 : index
    %55 = vector.load %arg10[%c0_47, %c0_48] : memref<288x32xf32, #tpu.memory_space<vmem>>, vector<288x32xf32>
    %cst_49 = arith.constant dense<0.000000e+00> : vector<32x32xf32>
    %56 = tpu.matmul %54, %55, %cst_49 {dimension_numbers = #tpu.dot_dimension_numbers<[1], [0], [0], [1], [0, 0, 1, 1], [], []>} : vector<32x288xf32>, vector<288x32xf32>, vector<32x32xf32> -> vector<32x32xf32>
    %c1_50 = arith.constant 1 : index
    %c0_51 = arith.constant 0 : index
    %c0_52 = arith.constant 0 : index
    %57 = vector.load %arg8[%c1_50, %c0_51, %c0_52] : memref<4x32x1xf32, #tpu.memory_space<vmem>>, vector<1x32x1xf32>
    %58 = vector.shape_cast %57 : vector<1x32x1xf32> to vector<32x1xf32>
    %59 = vector.broadcast %58 : vector<32x1xf32> to vector<32x32xf32>
    %60 = arith.addf %56, %59 : vector<32x32xf32>
    %cst_53 = arith.constant 0.000000e+00 : f32
    %61 = vector.broadcast %cst_53 : f32 to vector<32x32xf32>
    %62 = arith.maximumf %60, %61 : vector<32x32xf32>
    %c0_54 = arith.constant 0 : index
    %c0_55 = arith.constant 0 : index
    %c0_56 = arith.constant 0 : index
    %63 = vector.load %arg2[%c0_54, %c0_55, %c0_56] : memref<9x32x8xf32, #tpu.memory_space<vmem>>, vector<1x32x8xf32>
    %64 = vector.shape_cast %63 : vector<1x32x8xf32> to vector<32x8xf32>
    %cst_57 = arith.constant dense<0.000000e+00> : vector<32x8xf32>
    %65 = tpu.matmul %62, %64, %cst_57 {dimension_numbers = #tpu.dot_dimension_numbers<[1], [0], [0], [1], [0, 0, 1, 1], [], []>} : vector<32x32xf32>, vector<32x8xf32>, vector<32x8xf32> -> vector<32x8xf32>
    %c0_58 = arith.constant 0 : index
    %c0_59 = arith.constant 0 : index
    %66 = vector.load %arg10[%c0_58, %c0_59] : memref<288x32xf32, #tpu.memory_space<vmem>>, vector<32x8xf32>
    tpu.vector_store %arg10[%c0_58, %c0_59], %65 {strides = array<i32>} : memref<288x32xf32, #tpu.memory_space<vmem>>, vector<32x8xf32>,
    %c1_60 = arith.constant 1 : index
    %c0_61 = arith.constant 0 : index
    %c0_62 = arith.constant 0 : index
    %67 = vector.load %arg2[%c1_60, %c0_61, %c0_62] : memref<9x32x8xf32, #tpu.memory_space<vmem>>, vector<1x32x8xf32>
    %68 = vector.shape_cast %67 : vector<1x32x8xf32> to vector<32x8xf32>
    %cst_63 = arith.constant dense<0.000000e+00> : vector<32x8xf32>
    %69 = tpu.matmul %62, %68, %cst_63 {dimension_numbers = #tpu.dot_dimension_numbers<[1], [0], [0], [1], [0, 0, 1, 1], [], []>} : vector<32x32xf32>, vector<32x8xf32>, vector<32x8xf32> -> vector<32x8xf32>
    %c32_64 = arith.constant 32 : index
    %c0_65 = arith.constant 0 : index
    %70 = vector.load %arg10[%c32_64, %c0_65] : memref<288x32xf32, #tpu.memory_space<vmem>>, vector<32x8xf32>
    tpu.vector_store %arg10[%c32_64, %c0_65], %69 {strides = array<i32>} : memref<288x32xf32, #tpu.memory_space<vmem>>, vector<32x8xf32>,
    %c2_66 = arith.constant 2 : index
    %c0_67 = arith.constant 0 : index
    %c0_68 = arith.constant 0 : index
    %71 = vector.load %arg2[%c2_66, %c0_67, %c0_68] : memref<9x32x8xf32, #tpu.memory_space<vmem>>, vector<1x32x8xf32>
    %72 = vector.shape_cast %71 : vector<1x32x8xf32> to vector<32x8xf32>
    %cst_69 = arith.constant dense<0.000000e+00> : vector<32x8xf32>
    %73 = tpu.matmul %62, %72, %cst_69 {dimension_numbers = #tpu.dot_dimension_numbers<[1], [0], [0], [1], [0, 0, 1, 1], [], []>} : vector<32x32xf32>, vector<32x8xf32>, vector<32x8xf32> -> vector<32x8xf32>
    %c64_70 = arith.constant 64 : index
    %c0_71 = arith.constant 0 : index
    %74 = vector.load %arg10[%c64_70, %c0_71] : memref<288x32xf32, #tpu.memory_space<vmem>>, vector<32x8xf32>
    tpu.vector_store %arg10[%c64_70, %c0_71], %73 {strides = array<i32>} : memref<288x32xf32, #tpu.memory_space<vmem>>, vector<32x8xf32>,
    %c3_72 = arith.constant 3 : index
    %c0_73 = arith.constant 0 : index
    %c0_74 = arith.constant 0 : index
    %75 = vector.load %arg2[%c3_72, %c0_73, %c0_74] : memref<9x32x8xf32, #tpu.memory_space<vmem>>, vector<1x32x8xf32>
    %76 = vector.shape_cast %75 : vector<1x32x8xf32> to vector<32x8xf32>
    %cst_75 = arith.constant dense<0.000000e+00> : vector<32x8xf32>
    %77 = tpu.matmul %62, %76, %cst_75 {dimension_numbers = #tpu.dot_dimension_numbers<[1], [0], [0], [1], [0, 0, 1, 1], [], []>} : vector<32x32xf32>, vector<32x8xf32>, vector<32x8xf32> -> vector<32x8xf32>
    %c96_76 = arith.constant 96 : index
    %c0_77 = arith.constant 0 : index
    %78 = vector.load %arg10[%c96_76, %c0_77] : memref<288x32xf32, #tpu.memory_space<vmem>>, vector<32x8xf32>
    tpu.vector_store %arg10[%c96_76, %c0_77], %77 {strides = array<i32>} : memref<288x32xf32, #tpu.memory_space<vmem>>, vector<32x8xf32>,
    %c4_78 = arith.constant 4 : index
    %c0_79 = arith.constant 0 : index
    %c0_80 = arith.constant 0 : index
    %79 = vector.load %arg2[%c4_78, %c0_79, %c0_80] : memref<9x32x8xf32, #tpu.memory_space<vmem>>, vector<1x32x8xf32>
    %80 = vector.shape_cast %79 : vector<1x32x8xf32> to vector<32x8xf32>
    %cst_81 = arith.constant dense<0.000000e+00> : vector<32x8xf32>
    %81 = tpu.matmul %62, %80, %cst_81 {dimension_numbers = #tpu.dot_dimension_numbers<[1], [0], [0], [1], [0, 0, 1, 1], [], []>} : vector<32x32xf32>, vector<32x8xf32>, vector<32x8xf32> -> vector<32x8xf32>
    %c128_82 = arith.constant 128 : index
    %c0_83 = arith.constant 0 : index
    %82 = vector.load %arg10[%c128_82, %c0_83] : memref<288x32xf32, #tpu.memory_space<vmem>>, vector<32x8xf32>
    tpu.vector_store %arg10[%c128_82, %c0_83], %81 {strides = array<i32>} : memref<288x32xf32, #tpu.memory_space<vmem>>, vector<32x8xf32>,
    %c5_84 = arith.constant 5 : index
    %c0_85 = arith.constant 0 : index
    %c0_86 = arith.constant 0 : index
    %83 = vector.load %arg2[%c5_84, %c0_85, %c0_86] : memref<9x32x8xf32, #tpu.memory_space<vmem>>, vector<1x32x8xf32>
    %84 = vector.shape_cast %83 : vector<1x32x8xf32> to vector<32x8xf32>
    %cst_87 = arith.constant dense<0.000000e+00> : vector<32x8xf32>
    %85 = tpu.matmul %62, %84, %cst_87 {dimension_numbers = #tpu.dot_dimension_numbers<[1], [0], [0], [1], [0, 0, 1, 1], [], []>} : vector<32x32xf32>, vector<32x8xf32>, vector<32x8xf32> -> vector<32x8xf32>
    %c160_88 = arith.constant 160 : index
    %c0_89 = arith.constant 0 : index
    %86 = vector.load %arg10[%c160_88, %c0_89] : memref<288x32xf32, #tpu.memory_space<vmem>>, vector<32x8xf32>
    tpu.vector_store %arg10[%c160_88, %c0_89], %85 {strides = array<i32>} : memref<288x32xf32, #tpu.memory_space<vmem>>, vector<32x8xf32>,
    %c6_90 = arith.constant 6 : index
    %c0_91 = arith.constant 0 : index
    %c0_92 = arith.constant 0 : index
    %87 = vector.load %arg2[%c6_90, %c0_91, %c0_92] : memref<9x32x8xf32, #tpu.memory_space<vmem>>, vector<1x32x8xf32>
    %88 = vector.shape_cast %87 : vector<1x32x8xf32> to vector<32x8xf32>
    %cst_93 = arith.constant dense<0.000000e+00> : vector<32x8xf32>
    %89 = tpu.matmul %62, %88, %cst_93 {dimension_numbers = #tpu.dot_dimension_numbers<[1], [0], [0], [1], [0, 0, 1, 1], [], []>} : vector<32x32xf32>, vector<32x8xf32>, vector<32x8xf32> -> vector<32x8xf32>
    %c192_94 = arith.constant 192 : index
    %c0_95 = arith.constant 0 : index
    %90 = vector.load %arg10[%c192_94, %c0_95] : memref<288x32xf32, #tpu.memory_space<vmem>>, vector<32x8xf32>
    tpu.vector_store %arg10[%c192_94, %c0_95], %89 {strides = array<i32>} : memref<288x32xf32, #tpu.memory_space<vmem>>, vector<32x8xf32>,
    %c7_96 = arith.constant 7 : index
    %c0_97 = arith.constant 0 : index
    %c0_98 = arith.constant 0 : index
    %91 = vector.load %arg2[%c7_96, %c0_97, %c0_98] : memref<9x32x8xf32, #tpu.memory_space<vmem>>, vector<1x32x8xf32>
    %92 = vector.shape_cast %91 : vector<1x32x8xf32> to vector<32x8xf32>
    %cst_99 = arith.constant dense<0.000000e+00> : vector<32x8xf32>
    %93 = tpu.matmul %62, %92, %cst_99 {dimension_numbers = #tpu.dot_dimension_numbers<[1], [0], [0], [1], [0, 0, 1, 1], [], []>} : vector<32x32xf32>, vector<32x8xf32>, vector<32x8xf32> -> vector<32x8xf32>
    %c224_100 = arith.constant 224 : index
    %c0_101 = arith.constant 0 : index
    %94 = vector.load %arg10[%c224_100, %c0_101] : memref<288x32xf32, #tpu.memory_space<vmem>>, vector<32x8xf32>
    tpu.vector_store %arg10[%c224_100, %c0_101], %93 {strides = array<i32>} : memref<288x32xf32, #tpu.memory_space<vmem>>, vector<32x8xf32>,
    %c8_102 = arith.constant 8 : index
    %c0_103 = arith.constant 0 : index
    %c0_104 = arith.constant 0 : index
    %95 = vector.load %arg2[%c8_102, %c0_103, %c0_104] : memref<9x32x8xf32, #tpu.memory_space<vmem>>, vector<1x32x8xf32>
    %96 = vector.shape_cast %95 : vector<1x32x8xf32> to vector<32x8xf32>
    %cst_105 = arith.constant dense<0.000000e+00> : vector<32x8xf32>
    %97 = tpu.matmul %62, %96, %cst_105 {dimension_numbers = #tpu.dot_dimension_numbers<[1], [0], [0], [1], [0, 0, 1, 1], [], []>} : vector<32x32xf32>, vector<32x8xf32>, vector<32x8xf32> -> vector<32x8xf32>
    %c256_106 = arith.constant 256 : index
    %c0_107 = arith.constant 0 : index
    %98 = vector.load %arg10[%c256_106, %c0_107] : memref<288x32xf32, #tpu.memory_space<vmem>>, vector<32x8xf32>
    tpu.vector_store %arg10[%c256_106, %c0_107], %97 {strides = array<i32>} : memref<288x32xf32, #tpu.memory_space<vmem>>, vector<32x8xf32>,
    %c0_108 = arith.constant 0 : index
    %c0_109 = arith.constant 0 : index
    %99 = vector.load %arg6[%c0_108, %c0_109] : memref<32x288xf32, #tpu.memory_space<vmem>>, vector<32x288xf32>
    %c0_110 = arith.constant 0 : index
    %c0_111 = arith.constant 0 : index
    %100 = vector.load %arg10[%c0_110, %c0_111] : memref<288x32xf32, #tpu.memory_space<vmem>>, vector<288x8xf32>
    %cst_112 = arith.constant dense<0.000000e+00> : vector<32x8xf32>
    %101 = tpu.matmul %99, %100, %cst_112 {dimension_numbers = #tpu.dot_dimension_numbers<[1], [0], [0], [1], [0, 0, 1, 1], [], []>} : vector<32x288xf32>, vector<288x8xf32>, vector<32x8xf32> -> vector<32x8xf32>
    %c2_113 = arith.constant 2 : index
    %c0_114 = arith.constant 0 : index
    %c0_115 = arith.constant 0 : index
    %102 = vector.load %arg8[%c2_113, %c0_114, %c0_115] : memref<4x32x1xf32, #tpu.memory_space<vmem>>, vector<1x32x1xf32>
    %103 = vector.shape_cast %102 : vector<1x32x1xf32> to vector<32x1xf32>
    %104 = vector.broadcast %103 : vector<32x1xf32> to vector<32x8xf32>
    %105 = arith.addf %101, %104 : vector<32x8xf32>
    %cst_116 = arith.constant 0.000000e+00 : f32
    %106 = vector.broadcast %cst_116 : f32 to vector<32x8xf32>
    %107 = arith.maximumf %105, %106 : vector<32x8xf32>
    %c0_117 = arith.constant 0 : index
    %c0_118 = arith.constant 0 : index
    %c0_119 = arith.constant 0 : index
    %108 = vector.load %arg3[%c0_117, %c0_118, %c0_119] : memref<9x8x2xf32, #tpu.memory_space<vmem>>, vector<1x8x2xf32>
    %109 = vector.shape_cast %108 : vector<1x8x2xf32> to vector<8x2xf32>
    %cst_120 = arith.constant dense<0.000000e+00> : vector<32x2xf32>
    %110 = tpu.matmul %107, %109, %cst_120 {dimension_numbers = #tpu.dot_dimension_numbers<[1], [0], [0], [1], [0, 0, 1, 1], [], []>} : vector<32x8xf32>, vector<8x2xf32>, vector<32x2xf32> -> vector<32x2xf32>
    %c0_121 = arith.constant 0 : index
    %c0_122 = arith.constant 0 : index
    %111 = vector.load %arg10[%c0_121, %c0_122] : memref<288x32xf32, #tpu.memory_space<vmem>>, vector<32x2xf32>
    tpu.vector_store %arg10[%c0_121, %c0_122], %110 {strides = array<i32>} : memref<288x32xf32, #tpu.memory_space<vmem>>, vector<32x2xf32>,
    %c1_123 = arith.constant 1 : index
    %c0_124 = arith.constant 0 : index
    %c0_125 = arith.constant 0 : index
    %112 = vector.load %arg3[%c1_123, %c0_124, %c0_125] : memref<9x8x2xf32, #tpu.memory_space<vmem>>, vector<1x8x2xf32>
    %113 = vector.shape_cast %112 : vector<1x8x2xf32> to vector<8x2xf32>
    %cst_126 = arith.constant dense<0.000000e+00> : vector<32x2xf32>
    %114 = tpu.matmul %107, %113, %cst_126 {dimension_numbers = #tpu.dot_dimension_numbers<[1], [0], [0], [1], [0, 0, 1, 1], [], []>} : vector<32x8xf32>, vector<8x2xf32>, vector<32x2xf32> -> vector<32x2xf32>
    %c32_127 = arith.constant 32 : index
    %c0_128 = arith.constant 0 : index
    %115 = vector.load %arg10[%c32_127, %c0_128] : memref<288x32xf32, #tpu.memory_space<vmem>>, vector<32x2xf32>
    tpu.vector_store %arg10[%c32_127, %c0_128], %114 {strides = array<i32>} : memref<288x32xf32, #tpu.memory_space<vmem>>, vector<32x2xf32>,
    %c2_129 = arith.constant 2 : index
    %c0_130 = arith.constant 0 : index
    %c0_131 = arith.constant 0 : index
    %116 = vector.load %arg3[%c2_129, %c0_130, %c0_131] : memref<9x8x2xf32, #tpu.memory_space<vmem>>, vector<1x8x2xf32>
    %117 = vector.shape_cast %116 : vector<1x8x2xf32> to vector<8x2xf32>
    %cst_132 = arith.constant dense<0.000000e+00> : vector<32x2xf32>
    %118 = tpu.matmul %107, %117, %cst_132 {dimension_numbers = #tpu.dot_dimension_numbers<[1], [0], [0], [1], [0, 0, 1, 1], [], []>} : vector<32x8xf32>, vector<8x2xf32>, vector<32x2xf32> -> vector<32x2xf32>
    %c64_133 = arith.constant 64 : index
    %c0_134 = arith.constant 0 : index
    %119 = vector.load %arg10[%c64_133, %c0_134] : memref<288x32xf32, #tpu.memory_space<vmem>>, vector<32x2xf32>
    tpu.vector_store %arg10[%c64_133, %c0_134], %118 {strides = array<i32>} : memref<288x32xf32, #tpu.memory_space<vmem>>, vector<32x2xf32>,
    %c3_135 = arith.constant 3 : index
    %c0_136 = arith.constant 0 : index
    %c0_137 = arith.constant 0 : index
    %120 = vector.load %arg3[%c3_135, %c0_136, %c0_137] : memref<9x8x2xf32, #tpu.memory_space<vmem>>, vector<1x8x2xf32>
    %121 = vector.shape_cast %120 : vector<1x8x2xf32> to vector<8x2xf32>
    %cst_138 = arith.constant dense<0.000000e+00> : vector<32x2xf32>
    %122 = tpu.matmul %107, %121, %cst_138 {dimension_numbers = #tpu.dot_dimension_numbers<[1], [0], [0], [1], [0, 0, 1, 1], [], []>} : vector<32x8xf32>, vector<8x2xf32>, vector<32x2xf32> -> vector<32x2xf32>
    %c96_139 = arith.constant 96 : index
    %c0_140 = arith.constant 0 : index
    %123 = vector.load %arg10[%c96_139, %c0_140] : memref<288x32xf32, #tpu.memory_space<vmem>>, vector<32x2xf32>
    tpu.vector_store %arg10[%c96_139, %c0_140], %122 {strides = array<i32>} : memref<288x32xf32, #tpu.memory_space<vmem>>, vector<32x2xf32>,
    %c4_141 = arith.constant 4 : index
    %c0_142 = arith.constant 0 : index
    %c0_143 = arith.constant 0 : index
    %124 = vector.load %arg3[%c4_141, %c0_142, %c0_143] : memref<9x8x2xf32, #tpu.memory_space<vmem>>, vector<1x8x2xf32>
    %125 = vector.shape_cast %124 : vector<1x8x2xf32> to vector<8x2xf32>
    %cst_144 = arith.constant dense<0.000000e+00> : vector<32x2xf32>
    %126 = tpu.matmul %107, %125, %cst_144 {dimension_numbers = #tpu.dot_dimension_numbers<[1], [0], [0], [1], [0, 0, 1, 1], [], []>} : vector<32x8xf32>, vector<8x2xf32>, vector<32x2xf32> -> vector<32x2xf32>
    %c128_145 = arith.constant 128 : index
    %c0_146 = arith.constant 0 : index
    %127 = vector.load %arg10[%c128_145, %c0_146] : memref<288x32xf32, #tpu.memory_space<vmem>>, vector<32x2xf32>
    tpu.vector_store %arg10[%c128_145, %c0_146], %126 {strides = array<i32>} : memref<288x32xf32, #tpu.memory_space<vmem>>, vector<32x2xf32>,
    %c5_147 = arith.constant 5 : index
    %c0_148 = arith.constant 0 : index
    %c0_149 = arith.constant 0 : index
    %128 = vector.load %arg3[%c5_147, %c0_148, %c0_149] : memref<9x8x2xf32, #tpu.memory_space<vmem>>, vector<1x8x2xf32>
    %129 = vector.shape_cast %128 : vector<1x8x2xf32> to vector<8x2xf32>
    %cst_150 = arith.constant dense<0.000000e+00> : vector<32x2xf32>
    %130 = tpu.matmul %107, %129, %cst_150 {dimension_numbers = #tpu.dot_dimension_numbers<[1], [0], [0], [1], [0, 0, 1, 1], [], []>} : vector<32x8xf32>, vector<8x2xf32>, vector<32x2xf32> -> vector<32x2xf32>
    %c160_151 = arith.constant 160 : index
    %c0_152 = arith.constant 0 : index
    %131 = vector.load %arg10[%c160_151, %c0_152] : memref<288x32xf32, #tpu.memory_space<vmem>>, vector<32x2xf32>
    tpu.vector_store %arg10[%c160_151, %c0_152], %130 {strides = array<i32>} : memref<288x32xf32, #tpu.memory_space<vmem>>, vector<32x2xf32>,
    %c6_153 = arith.constant 6 : index
    %c0_154 = arith.constant 0 : index
    %c0_155 = arith.constant 0 : index
    %132 = vector.load %arg3[%c6_153, %c0_154, %c0_155] : memref<9x8x2xf32, #tpu.memory_space<vmem>>, vector<1x8x2xf32>
    %133 = vector.shape_cast %132 : vector<1x8x2xf32> to vector<8x2xf32>
    %cst_156 = arith.constant dense<0.000000e+00> : vector<32x2xf32>
    %134 = tpu.matmul %107, %133, %cst_156 {dimension_numbers = #tpu.dot_dimension_numbers<[1], [0], [0], [1], [0, 0, 1, 1], [], []>} : vector<32x8xf32>, vector<8x2xf32>, vector<32x2xf32> -> vector<32x2xf32>
    %c192_157 = arith.constant 192 : index
    %c0_158 = arith.constant 0 : index
    %135 = vector.load %arg10[%c192_157, %c0_158] : memref<288x32xf32, #tpu.memory_space<vmem>>, vector<32x2xf32>
    tpu.vector_store %arg10[%c192_157, %c0_158], %134 {strides = array<i32>} : memref<288x32xf32, #tpu.memory_space<vmem>>, vector<32x2xf32>,
    %c7_159 = arith.constant 7 : index
    %c0_160 = arith.constant 0 : index
    %c0_161 = arith.constant 0 : index
    %136 = vector.load %arg3[%c7_159, %c0_160, %c0_161] : memref<9x8x2xf32, #tpu.memory_space<vmem>>, vector<1x8x2xf32>
    %137 = vector.shape_cast %136 : vector<1x8x2xf32> to vector<8x2xf32>
    %cst_162 = arith.constant dense<0.000000e+00> : vector<32x2xf32>
    %138 = tpu.matmul %107, %137, %cst_162 {dimension_numbers = #tpu.dot_dimension_numbers<[1], [0], [0], [1], [0, 0, 1, 1], [], []>} : vector<32x8xf32>, vector<8x2xf32>, vector<32x2xf32> -> vector<32x2xf32>
    %c224_163 = arith.constant 224 : index
    %c0_164 = arith.constant 0 : index
    %139 = vector.load %arg10[%c224_163, %c0_164] : memref<288x32xf32, #tpu.memory_space<vmem>>, vector<32x2xf32>
    tpu.vector_store %arg10[%c224_163, %c0_164], %138 {strides = array<i32>} : memref<288x32xf32, #tpu.memory_space<vmem>>, vector<32x2xf32>,
    %c8_165 = arith.constant 8 : index
    %c0_166 = arith.constant 0 : index
    %c0_167 = arith.constant 0 : index
    %140 = vector.load %arg3[%c8_165, %c0_166, %c0_167] : memref<9x8x2xf32, #tpu.memory_space<vmem>>, vector<1x8x2xf32>
    %141 = vector.shape_cast %140 : vector<1x8x2xf32> to vector<8x2xf32>
    %cst_168 = arith.constant dense<0.000000e+00> : vector<32x2xf32>
    %142 = tpu.matmul %107, %141, %cst_168 {dimension_numbers = #tpu.dot_dimension_numbers<[1], [0], [0], [1], [0, 0, 1, 1], [], []>} : vector<32x8xf32>, vector<8x2xf32>, vector<32x2xf32> -> vector<32x2xf32>
    %c256_169 = arith.constant 256 : index
    %c0_170 = arith.constant 0 : index
    %143 = vector.load %arg10[%c256_169, %c0_170] : memref<288x32xf32, #tpu.memory_space<vmem>>, vector<32x2xf32>
    tpu.vector_store %arg10[%c256_169, %c0_170], %142 {strides = array<i32>} : memref<288x32xf32, #tpu.memory_space<vmem>>, vector<32x2xf32>,
    %c0_171 = arith.constant 0 : index
    %c0_172 = arith.constant 0 : index
    %144 = vector.load %arg7[%c0_171, %c0_172] : memref<32x288xf32, #tpu.memory_space<vmem>>, vector<32x288xf32>
    %c0_173 = arith.constant 0 : index
    %c0_174 = arith.constant 0 : index
    %145 = vector.load %arg10[%c0_173, %c0_174] : memref<288x32xf32, #tpu.memory_space<vmem>>, vector<288x2xf32>
    %cst_175 = arith.constant dense<0.000000e+00> : vector<32x2xf32>
    %146 = tpu.matmul %144, %145, %cst_175 {dimension_numbers = #tpu.dot_dimension_numbers<[1], [0], [0], [1], [0, 0, 1, 1], [], []>} : vector<32x288xf32>, vector<288x2xf32>, vector<32x2xf32> -> vector<32x2xf32>
    %c3_176 = arith.constant 3 : index
    %c0_177 = arith.constant 0 : index
    %c0_178 = arith.constant 0 : index
    %147 = vector.load %arg8[%c3_176, %c0_177, %c0_178] : memref<4x32x1xf32, #tpu.memory_space<vmem>>, vector<1x32x1xf32>
    %148 = vector.shape_cast %147 : vector<1x32x1xf32> to vector<32x1xf32>
    %149 = vector.broadcast %148 : vector<32x1xf32> to vector<32x2xf32>
    %150 = arith.addf %146, %149 : vector<32x2xf32>
    %cst_179 = arith.constant 0.000000e+00 : f32
    %151 = vector.broadcast %cst_179 : f32 to vector<32x2xf32>
    %152 = arith.maximumf %150, %151 : vector<32x2xf32>
    %c0_180 = arith.constant 0 : index
    %c0_181 = arith.constant 0 : index
    %153 = vector.load %arg9[%c0_180, %c0_181] : memref<32x2xf32, #tpu.memory_space<vmem>>, vector<32x2xf32>
    tpu.vector_store %arg9[%c0_180, %c0_181], %152 {strides = array<i32>} : memref<32x2xf32, #tpu.memory_space<vmem>>, vector<32x2xf32>,
    return
  }
}

</mosaic_0001>

<bundles_post_ra>
// kernel: forward.1
= control target key start
LH: loop header
LB: loop body
LE: loop exit
PB: predicated region body
PF: predicated region fallthrough
CT: control target
= control target key end

     0   :  { %vm65_vm0 = vcmask 326656   ;;  %v5921_v3 = vmov 0   ;;  %vm284_vm1 = vcmask 261120   ;;  %vm1625_vm2 = vcmask 64512   ;;  %s6817_s0 = inlined_call_operand.vmem [shape: f32[40,128], index: 0, kind: input, shape index: {}]   ;;  %s6818_s4 = inlined_call_operand.vmem [shape: f32[32,40], index: 4, kind: input, shape index: {}]   ;;  %s6819_s8 = inlined_call_operand.vmem [shape: f32[4,32,1], index: 8, kind: input, shape index: {}]   ;;  %s6820_s1 = inlined_call_operand.vmem [shape: bf16[9,128,32], index: 1, kind: input, shape index: {}]   ;;  %s6821_s5 = inlined_call_operand.vmem [shape: f32[32,288], index: 5, kind: input, shape index: {}]   ;;  %s6822_s2 = inlined_call_operand.vmem [shape: f32[9,32,8], index: 2, kind: input, shape index: {}]   ;;  %s6823_s6 = inlined_call_operand.vmem [shape: f32[32,288], index: 6, kind: input, shape index: {}]   ;;  %s6824_s3 = inlined_call_operand.vmem [shape: f32[9,8,2], index: 3, kind: input, shape index: {}]   ;;  %s6825_s7 = inlined_call_operand.vmem [shape: f32[32,288], index: 7, kind: input, shape index: {}]   ;;  %s6826_s9 = inlined_call_operand.vmem [shape: f32[32,2], index: 9, kind: output, shape index: {}]  }
   0x1   :  { %v36_v0 = vld [vmem:[%s6817_s0] sm:$0xff]  ;;  %v37_v1 = vld [vmem:[%s6817_s0 + $0x8] sm:$0xff]  ;;  %v38_v2 = vld [vmem:[%s6817_s0 + $0x10] sm:$0xff]  ;;  %5919 = vset.pattern.permute.xlu0 %v5921_v3  ;;  %5920 = vset.pattern.permute.xlu1 %v5921_v3  ;;  %vm2739_vm3 = vcmask 15360  }
   0x2   :  { %v5426_v4 = vpack.c.bf16 %v37_v1, %v36_v0  ;;  %v39_v5 = vld [vmem:[%s6817_s0 + $0x18] sm:$0xff]  ;;  %v32_v6 = vld [vmem:[%s6818_s4] sm:$0xff]  ;;  %v42_v9 = vld [vmem:[%s6819_s8 + $0x8] sm:$0xff] }
   0x3   :  { %v5430_v7 = vpack.c.bf16 %v39_v5, %v38_v2  ;;  %4838 = vmatprep.mubr.msk.f32.mxu1 %vm65_vm0, %v32_v6  ;;  %v41_v8 = vld [vmem:[%s6819_s8] sm:$0xff]  ;;  %v43_v10 = vld [vmem:[%s6819_s8 + $0x10] sm:$0xff]  ;;  %v44_v12 = vld [vmem:[%s6819_s8 + $0x18] sm:$0xff] }
   0x4   :  { %5427 = vmatprep.subr.bf16.mxu1 %v5426_v4  ;;  %47 = vperm.xlu0 %5919, %v41_v8   ;;  %v40_v11 = vld [vmem:[%s6817_s0 + $0x20] sm:$0xff]  ;;  %v33_v15 = vld [vmem:[%s6818_s4 + $0x8] sm:$0xff]  ;;  %v34_v17 = vld [vmem:[%s6818_s4 + $0x10] sm:$0xff] }
   0x5   :  { %5429 = vmatpush3.bf16.msra.mxu1 %v5426_v4  ;;  %57 = vperm.xlu1 %5920, %v43_v10   ;;  %v4302_v13 = vld [vmem:[%s6820_s1 + $0x40] sm:$0xff]   ;;  %v3872_v18 = vld [vmem:[%s6819_s8 + $0x28] sm:$0xff]  ;;  %v3873_v20 = vld [vmem:[%s6819_s8 + $0x30] sm:$0xff] }
   0x6   :  { %5431 = vmatprep.subr.bf16.mxu1 %v5430_v7  ;;  %v3871_v14 = vld [vmem:[%s6819_s8 + $0x20] sm:$0xff]  ;;  %5467 = vmatprep.subr.bf16.mxu0 %v4302_v13  ;;  %v4303_v19 = vld [vmem:[%s6820_s1 + $0x48] sm:$0xff]   ;;  %v35_v22 = vld [vmem:[%s6818_s4 + $0x18] sm:$0xff] }
   0x7   :  { %v4008_v16 = vld [vmem:[%s6820_s1] sm:$0xff]   ;;  %5469 = vmatpush3.bf16.msra.mxu0 %v4302_v13  ;;  %v4295_v21 = vld [vmem:[%s6820_s1 + $0x8] sm:$0xff]   ;;  %v3874_v23 = vld [vmem:[%s6819_s8 + $0x38] sm:$0xff] }
   0x8   :  { %52 = vperm.xlu0 %5919, %v42_v9   ;;  %5471 = vmatprep.subr.bf16.mxu0 %v4303_v19  ;;  %v4304_v24 = vld [vmem:[%s6820_s1 + $0x50] sm:$0xff]   ;;  %v3947_v25 = vld [vmem:[%s6819_s8 + $0x40] sm:$0xff]  ;;  %v3948_v27 = vld [vmem:[%s6819_s8 + $0x48] sm:$0xff] }
   0x9   :  { %5433 = vmatpush3.bf16.msra.mxu1 %v5430_v7  ;;  %62 = vperm.xlu1 %5920, %v44_v12   ;;  %v4296_v26 = vld [vmem:[%s6820_s1 + $0x10] sm:$0xff]   ;;  %v4305_v28 = vld [vmem:[%s6820_s1 + $0x58] sm:$0xff]   ;;  %v4306_v32 = vld [vmem:[%s6820_s1 + $0x60] sm:$0xff]  }
   0xa   :  { %4836 = vmatprep.subr.mxu1 %v40_v11  ;;  %v3949_v29 = vld [vmem:[%s6819_s8 + $0x50] sm:$0xff]  ;;  %v4297_v30 = vld [vmem:[%s6820_s1 + $0x18] sm:$0xff]   ;;  %v3999_v33 = vld [vmem:[%s6819_s8 + $0x60] sm:$0xff] }
   0xb   :  { %5473 = vmatpush3.bf16.msra.mxu0 %v4303_v19  ;;  %v3950_v31 = vld [vmem:[%s6819_s8 + $0x58] sm:$0xff]  ;;  %v4298_v34 = vld [vmem:[%s6820_s1 + $0x20] sm:$0xff]   ;;  %v4000_v35 = vld [vmem:[%s6819_s8 + $0x68] sm:$0xff] }
   0xc   :  { %1320 = vperm.xlu0 %5919, %v3871_v14   ;;  %5475 = vmatprep.subr.bf16.mxu0 %v4304_v24  ;;  %v4307_v36 = vld [vmem:[%s6820_s1 + $0x68] sm:$0xff]   ;;  %v4001_v37 = vld [vmem:[%s6819_s8 + $0x70] sm:$0xff]  ;;  %v4002_v39 = vld [vmem:[%s6819_s8 + $0x78] sm:$0xff] }
   0xd   :  { %4837 = vmatpush3.msra.mxu1 %v40_v11  ;;  %1325 = vperm.xlu1 %5920, %v3872_v18   ;;  %v4299_v38 = vld [vmem:[%s6820_s1 + $0x28] sm:$0xff]   ;;  %v4308_v40 = vld [vmem:[%s6820_s1 + $0x70] sm:$0xff]   ;;  %v4301_v42 = vld [vmem:[%s6820_s1 + $0x38] sm:$0xff]  }
   0xe   :  { %4839 = vmatmul.mubr.msk.f32.vlgmr.msra.gmra.mrb[0].mxu1 %vm65_vm0, %v33_v15  ;;  %5435 = vmatprep.subr.bf16.mxu1 %v4008_v16  ;;  %v4300_v41 = vld [vmem:[%s6820_s1 + $0x30] sm:$0xff]   ;;  %v4309_v43 = vld [vmem:[%s6820_s1 + $0x78] sm:$0xff]   ;;  %v4310_v44 = vld [vmem:[%s6820_s1 + $0x80] sm:$0xff]  }
   0xf   :  { %4841 = vmatprep.mubr.msk.f32.mxu1 %vm65_vm0, %v34_v17  ;;  %5437 = vmatpush3.bf16.msra.mxu1 %v4008_v16  ;;  %v4318_v45 = vld [vmem:[%s6820_s1 + $0xc0] sm:$0xff]   ;;  %v4311_v60 = vld [vmem:[%s6820_s1 + $0x88] sm:$0xff]   ;;  %v4312_v0 = vld [vmem:[%s6820_s1 + $0x90] sm:$0xff]  }
  0x10   :  { %1330 = vperm.xlu0 %5919, %v3873_v20   ;;  %5439 = vmatprep.subr.bf16.mxu1 %v4295_v21  ;;  %v4319_v61 = vld [vmem:[%s6820_s1 + $0xc8] sm:$0xff]   ;;  %v4320_v1 = vld [vmem:[%s6820_s1 + $0xd0] sm:$0xff]   ;;  %v4313_v2 = vld [vmem:[%s6820_s1 + $0x98] sm:$0xff]  }
  0x11   :  { %1335 = vperm.xlu1 %5920, %v3874_v23   ;;  %5477 = vmatpush3.bf16.msra.mxu0 %v4304_v24  ;;  %v4321_v3 = vld [vmem:[%s6820_s1 + $0xd8] sm:$0xff]   ;;  %v4314_v4 = vld [vmem:[%s6820_s1 + $0xa0] sm:$0xff]   ;;  %v4315_v6 = vld [vmem:[%s6820_s1 + $0xa8] sm:$0xff]  }
  0x12   :  { %4842 = vmatmul.mubr.msk.f32.gmra.mrb[2].mxu1 %vm65_vm0, %v35_v22  ;;  %5479 = vmatprep.subr.bf16.mxu0 %v4305_v28  ;;  %v4322_v5 = vld [vmem:[%s6820_s1 + $0xe0] sm:$0xff]   ;;  %v4323_v7 = vld [vmem:[%s6820_s1 + $0xe8] sm:$0xff]   ;;  %v4316_v8 = vld [vmem:[%s6820_s1 + $0xb0] sm:$0xff]  }
  0x13   :  { %5441 = vmatpush3.bf16.msra.mxu1 %v4295_v21  ;;  %v4324_v9 = vld [vmem:[%s6820_s1 + $0xf0] sm:$0xff]   ;;  %v4317_v10 = vld [vmem:[%s6820_s1 + $0xb8] sm:$0xff]   ;;  %v4326_v12 = vld [vmem:[%s6820_s1 + $0x100] sm:$0xff]  }
  0x14   :  { %2437 = vperm.xlu0 %5919, %v3947_v25   ;;  %5443 = vmatprep.subr.bf16.mxu1 %v4296_v26  ;;  %v4325_v11 = vld [vmem:[%s6820_s1 + $0xf8] sm:$0xff]   ;;  %v4334_v13 = vld [vmem:[%s6820_s1 + $0x140] sm:$0xff]   ;;  %v4327_v14 = vld [vmem:[%s6820_s1 + $0x108] sm:$0xff]  }
  0x15   :  { %2442 = vperm.xlu1 %5920, %v3948_v27   ;;  %5481 = vmatpush3.bf16.msra.mxu0 %v4305_v28  ;;  %v4335_v15 = vld [vmem:[%s6820_s1 + $0x148] sm:$0xff]   ;;  %v4328_v16 = vld [vmem:[%s6820_s1 + $0x110] sm:$0xff]   ;;  %v4329_v18 = vld [vmem:[%s6820_s1 + $0x118] sm:$0xff]  }
  0x16   :  { %5483 = vmatprep.subr.bf16.mxu0 %v4306_v32  ;;  %v4336_v17 = vld [vmem:[%s6820_s1 + $0x150] sm:$0xff]   ;;  %v4337_v19 = vld [vmem:[%s6820_s1 + $0x158] sm:$0xff]   ;;  %v4330_v20 = vld [vmem:[%s6820_s1 + $0x120] sm:$0xff]  }
  0x17   :  { %5445 = vmatpush3.bf16.msra.mxu1 %v4296_v26  ;;  %v4338_v21 = vld [vmem:[%s6820_s1 + $0x160] sm:$0xff]   ;;  %v4331_v22 = vld [vmem:[%s6820_s1 + $0x128] sm:$0xff]   ;;  %v4332_v24 = vld [vmem:[%s6820_s1 + $0x130] sm:$0xff]  }
  0x18   :  { %2447 = vperm.xlu0 %5919, %v3949_v29   ;;  %5447 = vmatprep.subr.bf16.mxu1 %v4297_v30  ;;  %v4339_v23 = vld [vmem:[%s6820_s1 + $0x168] sm:$0xff]   ;;  %v4340_v25 = vld [vmem:[%s6820_s1 + $0x170] sm:$0xff]   ;;  %v4333_v26 = vld [vmem:[%s6820_s1 + $0x138] sm:$0xff]  }
  0x19   :  { %2452 = vperm.xlu1 %5920, %v3950_v31   ;;  %5485 = vmatpush3.bf16.msra.mxu0 %v4306_v32  ;;  %v4341_v27 = vld [vmem:[%s6820_s1 + $0x178] sm:$0xff]   ;;  %v4342_v28 = vld [vmem:[%s6820_s1 + $0x180] sm:$0xff]   ;;  %v4351_v31 = vld [vmem:[%s6820_s1 + $0x1c8] sm:$0xff]  }
  0x1a   :  { %5487 = vmatprep.subr.bf16.mxu0 %v4307_v36  ;;  %v4350_v29 = vld [vmem:[%s6820_s1 + $0x1c0] sm:$0xff]   ;;  %v4344_v32 = vld [vmem:[%s6820_s1 + $0x190] sm:$0xff]  }
  0x1b   :  { %5449 = vmatpush3.bf16.msra.mxu1 %v4297_v30  ;;  %v4343_v30 = vld [vmem:[%s6820_s1 + $0x188] sm:$0xff]  }
  0x1c   :  { %3527 = vperm.xlu0 %5919, %v3999_v33   ;;  %5451 = vmatprep.subr.bf16.mxu1 %v4298_v34  ;;  %v4352_v33 = vld [vmem:[%s6820_s1 + $0x1d0] sm:$0xff]  }
  0x1d   :  { %3532 = vperm.xlu1 %5920, %v4000_v35   ;;  %5489 = vmatpush3.bf16.msra.mxu0 %v4307_v36  ;;  %v4353_v35 = vld [vmem:[%s6820_s1 + $0x1d8] sm:$0xff]   ;;  %v4346_v36 = vld [vmem:[%s6820_s1 + $0x1a0] sm:$0xff]  }
  0x1e   :  { %5491 = vmatprep.subr.bf16.mxu0 %v4308_v40 }
  0x1f   :  { %5453 = vmatpush3.bf16.msra.mxu1 %v4298_v34  ;;  %v4345_v34 = vld [vmem:[%s6820_s1 + $0x198] sm:$0xff]  }
  0x20   :  { %3537 = vperm.xlu0 %5919, %v4001_v37   ;;  %5455 = vmatprep.subr.bf16.mxu1 %v4299_v38  ;;  %v4354_v37 = vld [vmem:[%s6820_s1 + $0x1e0] sm:$0xff]  }
  0x21   :  { %3542 = vperm.xlu1 %5920, %v4002_v39   ;;  %5493 = vmatpush3.bf16.msra.mxu0 %v4308_v40  ;;  %v4355_v39 = vld [vmem:[%s6820_s1 + $0x1e8] sm:$0xff]   ;;  %v4348_v40 = vld [vmem:[%s6820_s1 + $0x1b0] sm:$0xff]  }
  0x22   :  { %5495 = vmatprep.subr.bf16.mxu0 %v4309_v43 }
  0x23   :  { %5457 = vmatpush3.bf16.msra.mxu1 %v4299_v38  ;;  %v4347_v38 = vld [vmem:[%s6820_s1 + $0x1a8] sm:$0xff]  }
  0x24   :  { %5459 = vmatprep.subr.bf16.mxu1 %v4300_v41 }
  0x25   :  { %5497 = vmatpush3.bf16.msra.mxu0 %v4309_v43  ;;  %v4357_v43 = vld [vmem:[%s6820_s1 + $0x1f8] sm:$0xff]  }
  0x26   :  { %5531 = vmatprep.subr.bf16.mxu0 %v4318_v45 }
  0x27   :  { %5461 = vmatpush3.bf16.msra.mxu1 %v4300_v41  ;;  %v4356_v41 = vld [vmem:[%s6820_s1 + $0x1f0] sm:$0xff]  }
  0x28   :  { %5463 = vmatprep.subr.bf16.mxu1 %v4301_v42 }
  0x2b   :  { %5465 = vmatpush3.bf16.msra.mxu1 %v4301_v42  ;;  %v4349_v42 = vld [vmem:[%s6820_s1 + $0x1b8] sm:$0xff]  }
  0x2c   :  { %5499 = vmatprep.subr.bf16.mxu1 %v4310_v44 }
  0x83   :  { %v48_v46 = vpop.permute.xlu0 %47 }
  0x84   :  { %v58_v47 = vpop.permute.xlu1 %57 }
  0x87   :  { %v53_v48 = vpop.permute.xlu0 %52 }
  0x88   :  { %v63_v54 = vpop.permute.xlu1 %62 }
  0xe1   :  { %v4840_v49 = vpop.f32.mrb[0].mxu1 }
  0xe2   :  { %v150_v50 = vadd.f32 %v4840_v49, %v53_v48  ;;  %v144_v51 = vpop.f32.mrb[1].mxu1  ;;  %v4362_v48 = vld [vmem:[%s6820_s1 + $0x220] sm:$0xff]   ;;  %v4363_v49 = vld [vmem:[%s6820_s1 + $0x228] sm:$0xff]  }
  0xe3   :  { %v145_v52 = vadd.f32 %v144_v51, %v48_v46  ;;  %v4360_v46 = vld [vmem:[%s6820_s1 + $0x210] sm:$0xff]   ;;  %v4365_v51 = vld [vmem:[%s6820_s1 + $0x238] sm:$0xff]  }
  0xe4   :  { %v6107_v56 = vmax.f32 %v150_v50, 0.0  ;;  %v4364_v50 = vld [vmem:[%s6820_s1 + $0x230] sm:$0xff]  }
  0xe5   :  { %v6105_v53 = vmax.f32 %v145_v52, 0.0  ;;  %v4843_v55 = vpop.f32.mrb[2].mxu1  ;;  %v1266_v52 = vld [vmem:[%s6821_s5 + $0x8] sm:$0xff] }
  0xe6   :  { %v160_v57 = vadd.f32 %v4843_v55, %v63_v54  ;;  %v154_v58 = vpop.f32.mrb[3].mxu1 }
  0xe7   :  { %v155_v59 = vadd.f32 %v154_v58, %v58_v47  ;;  %4876 = vmatprep.mubr.f32.mxu1 %v6105_v53  ;;  %4914 = vmatprep.mubr.f32.mxu0 %v6105_v53  ;;  %v4361_v47 = vld [vmem:[%s6820_s1 + $0x218] sm:$0xff]  }
  0xe8   :  { %v6117_v62 = vmax.f32 %v160_v57, 0.0  ;;  %4877 = vmatmul.mubr.f32.vlgmr.msra.gmra.mrb[4].mxu1 %v6107_v56  ;;  %4915 = vmatmul.mubr.f32.vlgmr.msra.gmra.mrb[0].mxu0 %v6107_v56 }
  0xe9   :  { %v6121_v63 = vmax.f32 %v155_v59, 0.0  ;;  %5501 = vmatpush3.bf16.msra.mxu1 %v4310_v44  ;;  %5533 = vmatpush3.bf16.msra.mxu0 %v4318_v45  ;;  %v4358_v44 = vld [vmem:[%s6820_s1 + $0x200] sm:$0xff]   ;;  %v4359_v45 = vld [vmem:[%s6820_s1 + $0x208] sm:$0xff]  }
  0xea   :  { %5503 = vmatprep.subr.bf16.mxu1 %v4311_v60  ;;  %5535 = vmatprep.subr.bf16.mxu0 %v4319_v61 }
  0xeb   :  { %4879 = vmatprep.mubr.f32.mxu1 %v6121_v63  ;;  %4917 = vmatprep.mubr.f32.mxu0 %v6121_v63 }
  0xec   :  { %4880 = vmatmul.mubr.f32.gmra.mrb[6].mxu1 %v6117_v62  ;;  %4918 = vmatmul.mubr.f32.gmra.mrb[2].mxu0 %v6117_v62 }
  0xed   :  { %5505 = vmatpush3.bf16.msra.mxu1 %v4311_v60  ;;  %5537 = vmatpush3.bf16.msra.mxu0 %v4319_v61  ;;  %v1267_v61 = vld [vmem:[%s6821_s5 + $0x10] sm:$0xff] }
  0xee   :  { %4952 = vmatprep.mubr.f32.mxu1 %v6105_v53  ;;  %4990 = vmatprep.mubr.f32.mxu0 %v6105_v53 }
  0xef   :  { %5507 = vmatprep.subr.bf16.mxu1 %v4312_v0  ;;  %5539 = vmatprep.subr.bf16.mxu0 %v4320_v1 }
  0xf1   :  { %5509 = vmatpush3.bf16.msra.mxu1 %v4312_v0  ;;  %5541 = vmatpush3.bf16.msra.mxu0 %v4320_v1 }
  0xf2   :  { %5511 = vmatprep.subr.bf16.mxu1 %v4313_v2  ;;  %5543 = vmatprep.subr.bf16.mxu0 %v4321_v3 }
  0xf5   :  { %5513 = vmatpush3.bf16.msra.mxu1 %v4313_v2  ;;  %5545 = vmatpush3.bf16.msra.mxu0 %v4321_v3 }
  0xf6   :  { %5515 = vmatprep.subr.bf16.mxu1 %v4314_v4  ;;  %5547 = vmatprep.subr.bf16.mxu0 %v4322_v5 }
  0xf9   :  { %5517 = vmatpush3.bf16.msra.mxu1 %v4314_v4  ;;  %5549 = vmatpush3.bf16.msra.mxu0 %v4322_v5 }
  0xfa   :  { %5519 = vmatprep.subr.bf16.mxu1 %v4315_v6  ;;  %5551 = vmatprep.subr.bf16.mxu0 %v4323_v7 }
  0xfd   :  { %5521 = vmatpush3.bf16.msra.mxu1 %v4315_v6  ;;  %5553 = vmatpush3.bf16.msra.mxu0 %v4323_v7 }
  0xfe   :  { %5523 = vmatprep.subr.bf16.mxu1 %v4316_v8  ;;  %5555 = vmatprep.subr.bf16.mxu0 %v4324_v9 }
 0x101   :  { %5525 = vmatpush3.bf16.msra.mxu1 %v4316_v8  ;;  %5557 = vmatpush3.bf16.msra.mxu0 %v4324_v9 }
 0x102   :  { %5527 = vmatprep.subr.bf16.mxu1 %v4317_v10  ;;  %5559 = vmatprep.subr.bf16.mxu0 %v4325_v11 }
 0x105   :  { %5529 = vmatpush3.bf16.msra.mxu1 %v4317_v10  ;;  %5561 = vmatpush3.bf16.msra.mxu0 %v4325_v11 }
 0x106   :  { %5563 = vmatprep.subr.bf16.mxu1 %v4326_v12  ;;  %5595 = vmatprep.subr.bf16.mxu0 %v4334_v13 }
 0x108   :  { %4953 = vmatmul.mubr.f32.vlgmr.msra.gmra.mrb[8].mxu1 %v6107_v56  ;;  %4991 = vmatmul.mubr.f32.vlgmr.msra.gmra.mrb[4].mxu0 %v6107_v56 }
 0x109   :  { %4955 = vmatprep.mubr.f32.mxu1 %v6121_v63  ;;  %4993 = vmatprep.mubr.f32.mxu0 %v6121_v63 }
 0x10a   :  { %5565 = vmatpush3.bf16.msra.mxu1 %v4326_v12  ;;  %5597 = vmatpush3.bf16.msra.mxu0 %v4334_v13 }
 0x10b   :  { %5567 = vmatprep.subr.bf16.mxu1 %v4327_v14  ;;  %5599 = vmatprep.subr.bf16.mxu0 %v4335_v15 }
 0x10c   :  { %4956 = vmatmul.mubr.f32.gmra.mrb[10].mxu1 %v6117_v62  ;;  %4994 = vmatmul.mubr.f32.gmra.mrb[6].mxu0 %v6117_v62 }
 0x10d   :  { %5028 = vmatprep.mubr.f32.mxu1 %v6105_v53  ;;  %5066 = vmatprep.mubr.f32.mxu0 %v6105_v53 }
 0x10e   :  { %5569 = vmatpush3.bf16.msra.mxu1 %v4327_v14  ;;  %5601 = vmatpush3.bf16.msra.mxu0 %v4335_v15 }
 0x10f   :  { %5571 = vmatprep.subr.bf16.mxu1 %v4328_v16  ;;  %5603 = vmatprep.subr.bf16.mxu0 %v4336_v17 }
 0x112   :  { %5573 = vmatpush3.bf16.msra.mxu1 %v4328_v16  ;;  %5605 = vmatpush3.bf16.msra.mxu0 %v4336_v17 }
 0x113   :  { %5575 = vmatprep.subr.bf16.mxu1 %v4329_v18  ;;  %5607 = vmatprep.subr.bf16.mxu0 %v4337_v19 }
 0x116   :  { %5577 = vmatpush3.bf16.msra.mxu1 %v4329_v18  ;;  %5609 = vmatpush3.bf16.msra.mxu0 %v4337_v19 }
 0x117   :  { %5579 = vmatprep.subr.bf16.mxu1 %v4330_v20  ;;  %5611 = vmatprep.subr.bf16.mxu0 %v4338_v21 }
 0x11a   :  { %5581 = vmatpush3.bf16.msra.mxu1 %v4330_v20  ;;  %5613 = vmatpush3.bf16.msra.mxu0 %v4338_v21 }
 0x11b   :  { %5583 = vmatprep.subr.bf16.mxu1 %v4331_v22  ;;  %5615 = vmatprep.subr.bf16.mxu0 %v4339_v23 }
 0x11e   :  { %5585 = vmatpush3.bf16.msra.mxu1 %v4331_v22  ;;  %5617 = vmatpush3.bf16.msra.mxu0 %v4339_v23 }
 0x11f   :  { %5587 = vmatprep.subr.bf16.mxu1 %v4332_v24  ;;  %5619 = vmatprep.subr.bf16.mxu0 %v4340_v25 }
 0x122   :  { %5589 = vmatpush3.bf16.msra.mxu1 %v4332_v24  ;;  %5621 = vmatpush3.bf16.msra.mxu0 %v4340_v25 }
 0x123   :  { %5591 = vmatprep.subr.bf16.mxu1 %v4333_v26  ;;  %5623 = vmatprep.subr.bf16.mxu0 %v4341_v27 }
 0x126   :  { %5593 = vmatpush3.bf16.msra.mxu1 %v4333_v26  ;;  %5625 = vmatpush3.bf16.msra.mxu0 %v4341_v27 }
 0x127   :  { %5627 = vmatprep.subr.bf16.mxu1 %v4342_v28  ;;  %5659 = vmatprep.subr.bf16.mxu0 %v4350_v29 }
 0x129   :  { %5029 = vmatmul.mubr.f32.vlgmr.msra.gmra.mrb[12].mxu1 %v6107_v56  ;;  %5067 = vmatmul.mubr.f32.vlgmr.msra.gmra.mrb[8].mxu0 %v6107_v56 }
 0x12a   :  { %5031 = vmatprep.mubr.f32.mxu1 %v6121_v63  ;;  %5069 = vmatprep.mubr.f32.mxu0 %v6121_v63 }
 0x12b   :  { %5629 = vmatpush3.bf16.msra.mxu1 %v4342_v28  ;;  %5661 = vmatpush3.bf16.msra.mxu0 %v4350_v29 }
 0x12c   :  { %5631 = vmatprep.subr.bf16.mxu1 %v4343_v30  ;;  %5663 = vmatprep.subr.bf16.mxu0 %v4351_v31 }
 0x12d   :  { %5032 = vmatmul.mubr.f32.gmra.mrb[14].mxu1 %v6117_v62  ;;  %5070 = vmatmul.mubr.f32.gmra.mrb[10].mxu0 %v6117_v62 }
 0x12e   :  { %5104 = vmatprep.mubr.f32.mxu1 %v6105_v53  ;;  %5142 = vmatprep.mubr.f32.mxu0 %v6105_v53 }
 0x12f   :  { %5633 = vmatpush3.bf16.msra.mxu1 %v4343_v30  ;;  %5665 = vmatpush3.bf16.msra.mxu0 %v4351_v31 }
 0x130   :  { %5635 = vmatprep.subr.bf16.mxu1 %v4344_v32  ;;  %5667 = vmatprep.subr.bf16.mxu0 %v4352_v33 }
 0x133   :  { %5637 = vmatpush3.bf16.msra.mxu1 %v4344_v32  ;;  %5669 = vmatpush3.bf16.msra.mxu0 %v4352_v33 }
 0x134   :  { %5639 = vmatprep.subr.bf16.mxu1 %v4345_v34  ;;  %5671 = vmatprep.subr.bf16.mxu0 %v4353_v35 }
 0x137   :  { %5641 = vmatpush3.bf16.msra.mxu1 %v4345_v34  ;;  %5673 = vmatpush3.bf16.msra.mxu0 %v4353_v35 }
 0x138   :  { %5643 = vmatprep.subr.bf16.mxu1 %v4346_v36  ;;  %5675 = vmatprep.subr.bf16.mxu0 %v4354_v37 }
 0x13b   :  { %5645 = vmatpush3.bf16.msra.mxu1 %v4346_v36  ;;  %5677 = vmatpush3.bf16.msra.mxu0 %v4354_v37 }
 0x13c   :  { %5647 = vmatprep.subr.bf16.mxu1 %v4347_v38  ;;  %5679 = vmatprep.subr.bf16.mxu0 %v4355_v39 }
 0x13f   :  { %5649 = vmatpush3.bf16.msra.mxu1 %v4347_v38  ;;  %5681 = vmatpush3.bf16.msra.mxu0 %v4355_v39 }
 0x140   :  { %5651 = vmatprep.subr.bf16.mxu1 %v4348_v40  ;;  %5683 = vmatprep.subr.bf16.mxu0 %v4356_v41 }
 0x143   :  { %5653 = vmatpush3.bf16.msra.mxu1 %v4348_v40  ;;  %5685 = vmatpush3.bf16.msra.mxu0 %v4356_v41 }
 0x144   :  { %5655 = vmatprep.subr.bf16.mxu1 %v4349_v42  ;;  %5687 = vmatprep.subr.bf16.mxu0 %v4357_v43 }
 0x147   :  { %5657 = vmatpush3.bf16.msra.mxu1 %v4349_v42  ;;  %5689 = vmatpush3.bf16.msra.mxu0 %v4357_v43 }
 0x148   :  { %5691 = vmatprep.subr.bf16.mxu1 %v4358_v44 }
 0x14a   :  { %5105 = vmatmul.mubr.f32.vlgmr.msra.gmra.mrb[16].mxu1 %v6107_v56  ;;  %5143 = vmatmul.mubr.f32.vlgmr.msra.gmra.mrb[12].mxu0 %v6107_v56 }
 0x14b   :  { %5107 = vmatprep.mubr.f32.mxu1 %v6121_v63  ;;  %5145 = vmatprep.mubr.f32.mxu0 %v6121_v63 }
 0x14c   :  { %5693 = vmatpush3.bf16.msra.mxu1 %v4358_v44 }
 0x14d   :  { %5695 = vmatprep.subr.bf16.mxu1 %v4359_v45 }
 0x14e   :  { %5108 = vmatmul.mubr.f32.gmra.mrb[18].mxu1 %v6117_v62  ;;  %5146 = vmatmul.mubr.f32.gmra.mrb[14].mxu0 %v6117_v62 }
 0x14f   :  { %5180 = vmatprep.mubr.f32.mxu1 %v6105_v53  ;;  %1414 = vmatprep.mubr.f32.mxu0 %v1266_v52 }
 0x150   :  { %5697 = vmatpush3.bf16.msra.mxu1 %v4359_v45 }
 0x151   :  { %5699 = vmatprep.subr.bf16.mxu1 %v4360_v46 }
 0x154   :  { %5701 = vmatpush3.bf16.msra.mxu1 %v4360_v46 }
 0x155   :  { %5703 = vmatprep.subr.bf16.mxu1 %v4361_v47 }
 0x158   :  { %5705 = vmatpush3.bf16.msra.mxu1 %v4361_v47 }
 0x159   :  { %5707 = vmatprep.subr.bf16.mxu1 %v4362_v48 }
 0x15c   :  { %5709 = vmatpush3.bf16.msra.mxu1 %v4362_v48 }
 0x15d   :  { %5711 = vmatprep.subr.bf16.mxu1 %v4363_v49 }
 0x160   :  { %5713 = vmatpush3.bf16.msra.mxu1 %v4363_v49 }
 0x161   :  { %5715 = vmatprep.subr.bf16.mxu1 %v4364_v50 }
 0x164   :  { %5717 = vmatpush3.bf16.msra.mxu1 %v4364_v50 }
 0x165   :  { %5719 = vmatprep.subr.bf16.mxu1 %v4365_v51 }
 0x168   :  { %5721 = vmatpush3.bf16.msra.mxu1 %v4365_v51 }
 0x16b   :  { %5181 = vmatmul.mubr.f32.vlgmr.msra.gmra.mrb[20].mxu1 %v6107_v56 }
 0x16c   :  { %5183 = vmatprep.mubr.f32.mxu1 %v6121_v63 }
 0x16f   :  { %5184 = vmatmul.mubr.f32.gmra.mrb[22].mxu1 %v6117_v62 }
 0x170   :  { %5194 = vmatprep.mubr.msk.f32.mxu1 %vm284_vm1, %v1267_v61 }
 0x1bb   :  { %v4878_v53 = vpop.f32.mrb[4].mxu1  ;;  %v4916_v54 = vpop.f32.mrb[0].mxu0 }
 0x1bc   :  { %286 = vst.msk [vmem:[#allocation2 + $0x8] sm:$0xff] %vm284_vm1, %v4878_v53  ;;  %408 = vst.msk [vmem:[#allocation2 + $0x28] sm:$0xff] %vm284_vm1, %v4916_v54  ;;  %v265_v55 = vpop.f32.mrb[5].mxu1  ;;  %v388_v57 = vpop.f32.mrb[1].mxu0 }
 0x1bd   :  { %285 = vst.msk [vmem:[#allocation2] sm:$0xff] %vm284_vm1, %v265_v55  ;;  %407 = vst.msk [vmem:[#allocation2 + $0x20] sm:$0xff] %vm284_vm1, %v388_v57 }
 0x1bf   :  { %v4881_v56 = vpop.f32.mrb[6].mxu1  ;;  %v4919_v58 = vpop.f32.mrb[2].mxu0 }
 0x1c0   :  { %288 = vst.msk [vmem:[#allocation2 + $0x18] sm:$0xff] %vm284_vm1, %v4881_v56  ;;  %410 = vst.msk [vmem:[#allocation2 + $0x38] sm:$0xff] %vm284_vm1, %v4919_v58  ;;  %v275_v59 = vpop.f32.mrb[7].mxu1  ;;  %v398_v60 = vpop.f32.mrb[3].mxu0 }
 0x1c1   :  { %287 = vst.msk [vmem:[#allocation2 + $0x10] sm:$0xff] %vm284_vm1, %v275_v59  ;;  %409 = vst.msk [vmem:[#allocation2 + $0x30] sm:$0xff] %vm284_vm1, %v398_v60 }
 0x1c3   :  { %v1278_v16 = vld [vmem:[#allocation2 + $0x8] sm:$0xff] }
 0x1c4   :  { %v1277_v15 = vld [vmem:[#allocation2] sm:$0xff]  ;;  %v1282_v30 = vld [vmem:[#allocation2 + $0x28] sm:$0xff] }
 0x1c5   :  { %v5724_v19 = vpack.c.bf16 %v1278_v16, %v1277_v15  ;;  %v1281_v29 = vld [vmem:[#allocation2 + $0x20] sm:$0xff]  ;;  %v1274_v15 = vld [vmem:[%s6821_s5 + $0x48] sm:$0xff] }
 0x1c6   :  { %v5732_v33 = vpack.c.bf16 %v1282_v30, %v1281_v29  ;;  %v3892_v30 = vld [vmem:[%s6822_s2 + $0x48] sm:$0xff] }
 0x1c7   :  { %v1280_v22 = vld [vmem:[#allocation2 + $0x18] sm:$0xff] }
 0x1c8   :  { %v1279_v21 = vld [vmem:[#allocation2 + $0x10] sm:$0xff]  ;;  %v1284_v36 = vld [vmem:[#allocation2 + $0x38] sm:$0xff] }
 0x1c9   :  { %v5728_v27 = vpack.c.bf16 %v1280_v22, %v1279_v21  ;;  %v1283_v35 = vld [vmem:[#allocation2 + $0x30] sm:$0xff] }
 0x1ca   :  { %v5736_v37 = vpack.c.bf16 %v1284_v36, %v1283_v35  ;;  %v3894_v36 = vld [vmem:[%s6822_s2 + $0x58] sm:$0xff] }
 0x1db   :  { %v4954_v62 = vpop.f32.mrb[8].mxu1  ;;  %v4992_v63 = vpop.f32.mrb[4].mxu0 }
 0x1dc   :  { %530 = vst.msk [vmem:[#allocation2 + $0x48] sm:$0xff] %vm284_vm1, %v4954_v62  ;;  %652 = vst.msk [vmem:[#allocation2 + $0x68] sm:$0xff] %vm284_vm1, %v4992_v63  ;;  %v510_v0 = vpop.f32.mrb[9].mxu1  ;;  %v632_v1 = vpop.f32.mrb[5].mxu0 }
 0x1dd   :  { %529 = vst.msk [vmem:[#allocation2 + $0x40] sm:$0xff] %vm284_vm1, %v510_v0  ;;  %651 = vst.msk [vmem:[#allocation2 + $0x60] sm:$0xff] %vm284_vm1, %v632_v1 }
 0x1df   :  { %v4957_v2 = vpop.f32.mrb[10].mxu1  ;;  %v4995_v3 = vpop.f32.mrb[6].mxu0 }
 0x1e0   :  { %532 = vst.msk [vmem:[#allocation2 + $0x58] sm:$0xff] %vm284_vm1, %v4957_v2  ;;  %654 = vst.msk [vmem:[#allocation2 + $0x78] sm:$0xff] %vm284_vm1, %v4995_v3  ;;  %v520_v4 = vpop.f32.mrb[11].mxu1  ;;  %v642_v5 = vpop.f32.mrb[7].mxu0 }
 0x1e1   :  { %531 = vst.msk [vmem:[#allocation2 + $0x50] sm:$0xff] %vm284_vm1, %v520_v4  ;;  %653 = vst.msk [vmem:[#allocation2 + $0x70] sm:$0xff] %vm284_vm1, %v642_v5 }
 0x1e3   :  { %v1286_v48 = vld [vmem:[#allocation2 + $0x48] sm:$0xff] }
 0x1e4   :  { %v1285_v47 = vld [vmem:[#allocation2 + $0x40] sm:$0xff]  ;;  %v1290_v62 = vld [vmem:[#allocation2 + $0x68] sm:$0xff] }
 0x1e5   :  { %v5740_v51 = vpack.c.bf16 %v1286_v48, %v1285_v47  ;;  %v1289_v61 = vld [vmem:[#allocation2 + $0x60] sm:$0xff] }
 0x1e6   :  { %v5748_v1 = vpack.c.bf16 %v1290_v62, %v1289_v61 }
 0x1e7   :  { %v1288_v54 = vld [vmem:[#allocation2 + $0x58] sm:$0xff] }
 0x1e8   :  { %v1287_v53 = vld [vmem:[#allocation2 + $0x50] sm:$0xff]  ;;  %v1292_v4 = vld [vmem:[#allocation2 + $0x78] sm:$0xff] }
 0x1e9   :  { %v5744_v59 = vpack.c.bf16 %v1288_v54, %v1287_v53  ;;  %v1291_v3 = vld [vmem:[#allocation2 + $0x70] sm:$0xff] }
 0x1ea   :  { %v5752_v5 = vpack.c.bf16 %v1292_v4, %v1291_v3  ;;  %v3909_v3 = vld [vmem:[%s6822_s2 + $0x90] sm:$0xff]  ;;  %v3910_v4 = vld [vmem:[%s6822_s2 + $0x98] sm:$0xff] }
 0x1fc   :  { %v5030_v6 = vpop.f32.mrb[12].mxu1  ;;  %v5068_v7 = vpop.f32.mrb[8].mxu0 }
 0x1fd   :  { %774 = vst.msk [vmem:[#allocation2 + $0x88] sm:$0xff] %vm284_vm1, %v5030_v6  ;;  %896 = vst.msk [vmem:[#allocation2 + $0xa8] sm:$0xff] %vm284_vm1, %v5068_v7  ;;  %v754_v8 = vpop.f32.mrb[13].mxu1  ;;  %v876_v9 = vpop.f32.mrb[9].mxu0  ;;  %v1265_v6 = vld [vmem:[%s6821_s5] sm:$0xff] }
 0x1fe   :  { %773 = vst.msk [vmem:[#allocation2 + $0x80] sm:$0xff] %vm284_vm1, %v754_v8  ;;  %895 = vst.msk [vmem:[#allocation2 + $0xa0] sm:$0xff] %vm284_vm1, %v876_v9  ;;  %v1269_v7 = vld [vmem:[%s6821_s5 + $0x20] sm:$0xff]  ;;  %v1268_v8 = vld [vmem:[%s6821_s5 + $0x18] sm:$0xff] }
 0x1ff   :  { %v1272_v9 = vld [vmem:[%s6821_s5 + $0x38] sm:$0xff] }
 0x200   :  { %v5033_v10 = vpop.f32.mrb[14].mxu1  ;;  %v5071_v11 = vpop.f32.mrb[10].mxu0 }
 0x201   :  { %776 = vst.msk [vmem:[#allocation2 + $0x98] sm:$0xff] %vm284_vm1, %v5033_v10  ;;  %898 = vst.msk [vmem:[#allocation2 + $0xb8] sm:$0xff] %vm284_vm1, %v5071_v11  ;;  %v764_v12 = vpop.f32.mrb[15].mxu1  ;;  %v886_v13 = vpop.f32.mrb[11].mxu0  ;;  %v1271_v11 = vld [vmem:[%s6821_s5 + $0x30] sm:$0xff] }
 0x202   :  { %775 = vst.msk [vmem:[#allocation2 + $0x90] sm:$0xff] %vm284_vm1, %v764_v12  ;;  %897 = vst.msk [vmem:[#allocation2 + $0xb0] sm:$0xff] %vm284_vm1, %v886_v13  ;;  %v1275_v13 = vld [vmem:[%s6821_s5 + $0x50] sm:$0xff] }
 0x204   :  { %v1294_v14 = vld [vmem:[#allocation2 + $0x88] sm:$0xff] }
 0x205   :  { %v1293_v17 = vld [vmem:[#allocation2 + $0x80] sm:$0xff]  ;;  %v1298_v25 = vld [vmem:[#allocation2 + $0xa8] sm:$0xff] }
 0x206   :  { %v5722_v18 = vpack.c.bf16 %v1294_v14, %v1293_v17  ;;  %v1297_v24 = vld [vmem:[#allocation2 + $0xa0] sm:$0xff] }
 0x207   :  { %v5730_v28 = vpack.c.bf16 %v1298_v25, %v1297_v24  ;;  %v1273_v24 = vld [vmem:[%s6821_s5 + $0x40] sm:$0xff]  ;;  %v1276_v25 = vld [vmem:[%s6821_s5 + $0x58] sm:$0xff] }
 0x208   :  { %5723 = vmatprep.subr.bf16.mxu0 %v5722_v18  ;;  %v1296_v20 = vld [vmem:[#allocation2 + $0x98] sm:$0xff] }
 0x209   :  { %5725 = vmatpush3.bf16.msra.mxu0 %v5724_v19  ;;  %v1295_v23 = vld [vmem:[#allocation2 + $0x90] sm:$0xff]  ;;  %v1300_v32 = vld [vmem:[#allocation2 + $0xb8] sm:$0xff] }
 0x20a   :  { %v5726_v26 = vpack.c.bf16 %v1296_v20, %v1295_v23  ;;  %v1299_v31 = vld [vmem:[#allocation2 + $0xb0] sm:$0xff]  ;;  %v1270_v23 = vld [vmem:[%s6821_s5 + $0x28] sm:$0xff] }
 0x20b   :  { %v5734_v34 = vpack.c.bf16 %v1300_v32, %v1299_v31  ;;  %v1526_v32 = vld [vmem:[%s6822_s2 + $0x10] sm:$0xff] }
 0x20c   :  { %5727 = vmatprep.subr.bf16.mxu0 %v5726_v26  ;;  %v1524_v26 = vld [vmem:[%s6822_s2] sm:$0xff] }
 0x20d   :  { %5729 = vmatpush3.bf16.msra.mxu0 %v5728_v27  ;;  %v1525_v27 = vld [vmem:[%s6822_s2 + $0x8] sm:$0xff] }
 0x20e   :  { %5731 = vmatprep.subr.bf16.mxu0 %v5730_v28  ;;  %v3891_v28 = vld [vmem:[%s6822_s2 + $0x40] sm:$0xff]  ;;  %v5762_v29 = vpack.c.bf16 %v1525_v27, %v1524_v26  ;;  %v3925_v26 = vld [vmem:[%s6822_s2 + $0xd0] sm:$0xff]  ;;  %v3926_v27 = vld [vmem:[%s6822_s2 + $0xd8] sm:$0xff] }
 0x20f   :  { %v5778_v31 = vpack.c.bf16 %v3892_v30, %v3891_v28  ;;  %v3915_v30 = vld [vmem:[%s6822_s2 + $0xa0] sm:$0xff] }
 0x211   :  { %5733 = vmatpush3.bf16.msra.mxu0 %v5732_v33  ;;  %v1527_v33 = vld [vmem:[%s6822_s2 + $0x18] sm:$0xff] }
 0x212   :  { %5735 = vmatprep.subr.bf16.mxu0 %v5734_v34  ;;  %v3893_v34 = vld [vmem:[%s6822_s2 + $0x50] sm:$0xff]  ;;  %v5766_v35 = vpack.c.bf16 %v1527_v33, %v1526_v32  ;;  %v3939_v32 = vld [vmem:[%s6822_s2 + $0x100] sm:$0xff]  ;;  %v3940_v33 = vld [vmem:[%s6822_s2 + $0x108] sm:$0xff] }
 0x215   :  { %5737 = vmatpush3.bf16.msra.mxu0 %v5736_v37  ;;  %v5782_v37 = vpack.c.bf16 %v3894_v36, %v3893_v34  ;;  %v3917_v36 = vld [vmem:[%s6822_s2 + $0xb0] sm:$0xff] }
 0x21d   :  { %v5106_v38 = vpop.f32.mrb[16].mxu1  ;;  %v5144_v39 = vpop.f32.mrb[12].mxu0 }
 0x21e   :  { %1018 = vst.msk [vmem:[#allocation2 + $0xc8] sm:$0xff] %vm284_vm1, %v5106_v38  ;;  %1140 = vst.msk [vmem:[#allocation2 + $0xe8] sm:$0xff] %vm284_vm1, %v5144_v39  ;;  %v998_v40 = vpop.f32.mrb[17].mxu1  ;;  %v1120_v41 = vpop.f32.mrb[13].mxu0  ;;  %v3883_v38 = vld [vmem:[%s6822_s2 + $0x20] sm:$0xff]  ;;  %v3884_v39 = vld [vmem:[%s6822_s2 + $0x28] sm:$0xff] }
 0x21f   :  { %1017 = vst.msk [vmem:[#allocation2 + $0xc0] sm:$0xff] %vm284_vm1, %v998_v40  ;;  %1139 = vst.msk [vmem:[#allocation2 + $0xe0] sm:$0xff] %vm284_vm1, %v1120_v41  ;;  %v3907_v40 = vld [vmem:[%s6822_s2 + $0x80] sm:$0xff]  ;;  %v5770_v41 = vpack.c.bf16 %v3884_v39, %v3883_v38  ;;  %v3941_v38 = vld [vmem:[%s6822_s2 + $0x110] sm:$0xff] }
 0x220   :  { %v3942_v39 = vld [vmem:[%s6822_s2 + $0x118] sm:$0xff] }
 0x221   :  { %v5109_v42 = vpop.f32.mrb[18].mxu1  ;;  %v5147_v43 = vpop.f32.mrb[14].mxu0 }
 0x222   :  { %1020 = vst.msk [vmem:[#allocation2 + $0xd8] sm:$0xff] %vm284_vm1, %v5109_v42  ;;  %1142 = vst.msk [vmem:[#allocation2 + $0xf8] sm:$0xff] %vm284_vm1, %v5147_v43  ;;  %v1008_v44 = vpop.f32.mrb[19].mxu1  ;;  %v1130_v45 = vpop.f32.mrb[15].mxu0  ;;  %v3908_v42 = vld [vmem:[%s6822_s2 + $0x88] sm:$0xff] }
 0x223   :  { %1019 = vst.msk [vmem:[#allocation2 + $0xd0] sm:$0xff] %vm284_vm1, %v1008_v44  ;;  %1141 = vst.msk [vmem:[#allocation2 + $0xf0] sm:$0xff] %vm284_vm1, %v1130_v45  ;;  %v5794_v43 = vpack.c.bf16 %v3908_v42, %v3907_v40  ;;  %v3931_v42 = vld [vmem:[%s6822_s2 + $0xe0] sm:$0xff] }
 0x225   :  { %v1302_v46 = vld [vmem:[#allocation2 + $0xc8] sm:$0xff] }
 0x226   :  { %v1301_v49 = vld [vmem:[#allocation2 + $0xc0] sm:$0xff]  ;;  %v1306_v56 = vld [vmem:[#allocation2 + $0xe8] sm:$0xff] }
 0x227   :  { %v5738_v50 = vpack.c.bf16 %v1302_v46, %v1301_v49  ;;  %v1305_v57 = vld [vmem:[#allocation2 + $0xe0] sm:$0xff] }
 0x228   :  { %v5746_v60 = vpack.c.bf16 %v1306_v56, %v1305_v57  ;;  %v1326_v57 = vpop.permute.xlu1 %1325  ;;  %v1321_v56 = vpop.permute.xlu0 %1320 }
 0x229   :  { %5739 = vmatprep.subr.bf16.mxu0 %v5738_v50  ;;  %v1304_v52 = vld [vmem:[#allocation2 + $0xd8] sm:$0xff] }
 0x22a   :  { %5741 = vmatpush3.bf16.msra.mxu0 %v5740_v51  ;;  %v1303_v55 = vld [vmem:[#allocation2 + $0xd0] sm:$0xff]  ;;  %v1308_v0 = vld [vmem:[#allocation2 + $0xf8] sm:$0xff] }
 0x22b   :  { %v5742_v58 = vpack.c.bf16 %v1304_v52, %v1303_v55  ;;  %v1307_v63 = vld [vmem:[#allocation2 + $0xf0] sm:$0xff] }
 0x22c   :  { %v5750_v2 = vpack.c.bf16 %v1308_v0, %v1307_v63  ;;  %v3885_v63 = vld [vmem:[%s6822_s2 + $0x30] sm:$0xff]  ;;  %v1336_v0 = vpop.permute.xlu1 %1335 }
 0x22d   :  { %5743 = vmatprep.subr.bf16.mxu0 %v5742_v58 }
 0x22e   :  { %5745 = vmatpush3.bf16.msra.mxu0 %v5744_v59 }
 0x22f   :  { %5747 = vmatprep.subr.bf16.mxu0 %v5746_v60 }
 0x232   :  { %5749 = vmatpush3.bf16.msra.mxu0 %v5748_v1 }
 0x233   :  { %5751 = vmatprep.subr.bf16.mxu0 %v5750_v2  ;;  %v3886_v2 = vld [vmem:[%s6822_s2 + $0x38] sm:$0xff] }
 0x236   :  { %5753 = vmatpush3.bf16.msra.mxu0 %v5752_v5  ;;  %v1331_v5 = vpop.permute.xlu0 %1330 }
 0x237   :  { %5779 = vmatprep.subr.bf16.mxu0 %v5778_v31 }
 0x239   :  { %1415 = vmatmul.mubr.f32.vlgmr.msra.gmra.mrb[16].mxu0 %v1265_v6 }
 0x23a   :  { %1419 = vmatprep.mubr.f32.mxu0 %v1269_v7  ;;  %5781 = vmatpush3.bf16.msra.mxu0 %v5778_v31  ;;  %v3916_v31 = vld [vmem:[%s6822_s2 + $0xa8] sm:$0xff] }
 0x23b   :  { %5783 = vmatprep.subr.bf16.mxu0 %v5782_v37  ;;  %v5802_v34 = vpack.c.bf16 %v3916_v31, %v3915_v30 }
 0x23d   :  { %1420 = vmatmul.mubr.f32.gmra.mrb[18].mxu0 %v1268_v8 }
 0x23e   :  { %v5182_v10 = vpop.f32.mrb[20].mxu1  ;;  %1424 = vmatprep.mubr.f32.mxu0 %v1272_v9  ;;  %5785 = vmatpush3.bf16.msra.mxu0 %v5782_v37  ;;  %v3918_v37 = vld [vmem:[%s6822_s2 + $0xb8] sm:$0xff] }
 0x23f   :  { %1262 = vst.msk [vmem:[#allocation2 + $0x108] sm:$0xff] %vm284_vm1, %v5182_v10  ;;  %v1242_v12 = vpop.f32.mrb[21].mxu1  ;;  %5795 = vmatprep.subr.bf16.mxu0 %v5794_v43  ;;  %v5806_v40 = vpack.c.bf16 %v3918_v37, %v3917_v36 }
 0x240   :  { %1261 = vst.msk [vmem:[#allocation2 + $0x100] sm:$0xff] %vm284_vm1, %v1242_v12 }
 0x241   :  { %1425 = vmatmul.mubr.f32.gmra.mrb[20].mxu0 %v1271_v11 }
 0x242   :  { %v5185_v14 = vpop.f32.mrb[22].mxu1  ;;  %1429 = vmatprep.mubr.f32.mxu0 %v1275_v13  ;;  %v5774_v13 = vpack.c.bf16 %v3886_v2, %v3885_v63 }
 0x243   :  { %1264 = vst.msk [vmem:[#allocation2 + $0x118] sm:$0xff] %vm284_vm1, %v5185_v14  ;;  %v1252_v16 = vpop.f32.mrb[23].mxu1  ;;  %v5798_v14 = vpack.c.bf16 %v3910_v4, %v3909_v3 }
 0x244   :  { %1263 = vst.msk [vmem:[#allocation2 + $0x110] sm:$0xff] %vm284_vm1, %v1252_v16  ;;  %v3899_v16 = vld [vmem:[%s6822_s2 + $0x60] sm:$0xff] }
 0x245   :  { %1430 = vmatmul.mubr.f32.gmra.mrb[22].mxu0 %v1274_v15 }
 0x246   :  { %v1310_v17 = vld [vmem:[#allocation2 + $0x108] sm:$0xff] }
 0x247   :  { %v1309_v18 = vld [vmem:[#allocation2 + $0x100] sm:$0xff] }
 0x248   :  { %v5754_v19 = vpack.c.bf16 %v1310_v17, %v1309_v18  ;;  %v3900_v17 = vld [vmem:[%s6822_s2 + $0x68] sm:$0xff]  ;;  %v3923_v18 = vld [vmem:[%s6822_s2 + $0xc0] sm:$0xff] }
 0x24a   :  { %5755 = vmatprep.subr.bf16.mxu1 %v5754_v19  ;;  %v1312_v20 = vld [vmem:[#allocation2 + $0x118] sm:$0xff] }
 0x24b   :  { %5757 = vmatpush3.bf16.msra.mxu1 %v5754_v19  ;;  %v1311_v21 = vld [vmem:[#allocation2 + $0x110] sm:$0xff]  ;;  %v3924_v19 = vld [vmem:[%s6822_s2 + $0xc8] sm:$0xff] }
 0x24c   :  { %v5758_v22 = vpack.c.bf16 %v1312_v20, %v1311_v21 }
 0x24e   :  { %5759 = vmatprep.subr.bf16.mxu1 %v5758_v22 }
 0x24f   :  { %5761 = vmatpush3.bf16.msra.mxu1 %v5758_v22  ;;  %v5786_v22 = vpack.c.bf16 %v3900_v17, %v3899_v16 }
 0x250   :  { %5763 = vmatprep.subr.bf16.mxu1 %v5762_v29 }
 0x252   :  { %5195 = vmatmul.mubr.msk.f32.vlgmr.msra.gmra.mrb[24].mxu1 %vm284_vm1, %v1270_v23  ;;  %v5810_v23 = vpack.c.bf16 %v3924_v19, %v3923_v18 }
 0x253   :  { %5197 = vmatprep.mubr.msk.f32.mxu1 %vm284_vm1, %v1273_v24  ;;  %5765 = vmatpush3.bf16.msra.mxu1 %v5762_v29  ;;  %v3901_v24 = vld [vmem:[%s6822_s2 + $0x70] sm:$0xff]  ;;  %v5814_v29 = vpack.c.bf16 %v3926_v27, %v3925_v26 }
 0x254   :  { %5767 = vmatprep.subr.bf16.mxu1 %v5766_v35 }
 0x256   :  { %5198 = vmatmul.mubr.msk.f32.gmra.mrb[26].mxu1 %vm284_vm1, %v1276_v25  ;;  %v3902_v25 = vld [vmem:[%s6822_s2 + $0x78] sm:$0xff] }
 0x257   :  { %5769 = vmatpush3.bf16.msra.mxu1 %v5766_v35  ;;  %v5790_v28 = vpack.c.bf16 %v3902_v25, %v3901_v24  ;;  %v5826_v35 = vpack.c.bf16 %v3940_v33, %v3939_v32 }
 0x258   :  { %5771 = vmatprep.subr.bf16.mxu1 %v5770_v41 }
 0x30c   :  { %v4587_v44 = vpop.f32.mrb[16].mxu0 }
 0x30d   :  { %v4588_v45 = vpop.f32.mrb[17].mxu0 }
 0x30e   :  { %v4589_v46 = vadd.f32 %v4588_v45, %v4587_v44  ;;  %v3933_v45 = vld [vmem:[%s6822_s2 + $0xf0] sm:$0xff] }
 0x310   :  { %v4590_v47 = vpop.f32.mrb[18].mxu0  ;;  %v1417_v60 = vadd.f32 %v4589_v46, %v1321_v56  ;;  %v3934_v46 = vld [vmem:[%s6822_s2 + $0xf8] sm:$0xff] }
 0x311   :  { %v4591_v48 = vpop.f32.mrb[19].mxu0 }
 0x312   :  { %v4592_v49 = vadd.f32 %v4591_v48, %v4590_v47  ;;  %v5822_v47 = vpack.c.bf16 %v3934_v46, %v3933_v45  ;;  %v2383_v48 = vld [vmem:[%s6823_s6 + $0x8] sm:$0xff] }
 0x314   :  { %v4593_v50 = vpop.f32.mrb[20].mxu0  ;;  %v1422_v58 = vadd.f32 %v4592_v49, %v1326_v57  ;;  %v2384_v49 = vld [vmem:[%s6823_s6 + $0x10] sm:$0xff] }
 0x315   :  { %v4594_v51 = vpop.f32.mrb[21].mxu0 }
 0x316   :  { %v4595_v52 = vadd.f32 %v4594_v51, %v4593_v50 }
 0x318   :  { %v4596_v53 = vpop.f32.mrb[22].mxu0  ;;  %v1427_v9 = vadd.f32 %v4595_v52, %v1331_v5 }
 0x319   :  { %v4597_v54 = vpop.f32.mrb[23].mxu0 }
 0x31a   :  { %v4598_v55 = vadd.f32 %v4597_v54, %v4596_v53 }
 0x31c   :  { %v1432_v6 = vadd.f32 %v4598_v55, %v1336_v0 }
 0x325   :  { %v5196_v59 = vpop.f32.mrb[24].mxu1 }
 0x326   :  { %v1507_v61 = vadd.f32 %v5196_v59, %v1422_v58  ;;  %v1501_v62 = vpop.f32.mrb[25].mxu1 }
 0x327   :  { %v1502_v1 = vadd.f32 %v1501_v62, %v1417_v60 }
 0x328   :  { %v6437_v10 = vmax.f32 %v1507_v61, 0.0 }
 0x329   :  { %v6435_v7 = vmax.f32 %v1502_v1, 0.0  ;;  %v5199_v8 = vpop.f32.mrb[26].mxu1 }
 0x32a   :  { %v1517_v11 = vadd.f32 %v5199_v8, %v1432_v6  ;;  %v1511_v12 = vpop.f32.mrb[27].mxu1 }
 0x32b   :  { %v1512_v15 = vadd.f32 %v1511_v12, %v1427_v9  ;;  %5208 = vmatprep.mubr.msk.f32.mxu1 %vm284_vm1, %v6435_v7  ;;  %5236 = vmatprep.mubr.msk.f32.mxu0 %vm284_vm1, %v6435_v7 }
 0x32c   :  { %5209 = vmatmul.mubr.msk.f32.vlgmr.msra.gmra.mrb[28].mxu1 %vm284_vm1, %v6437_v10  ;;  %5237 = vmatmul.mubr.msk.f32.vlgmr.msra.gmra.mrb[24].mxu0 %vm284_vm1, %v6437_v10  ;;  %v6461_v21 = vmax.f32 %v1517_v11, 0.0 }
 0x32d   :  { %v6459_v20 = vmax.f32 %v1512_v15, 0.0  ;;  %5773 = vmatpush3.bf16.msra.mxu1 %v5770_v41  ;;  %5797 = vmatpush3.bf16.msra.mxu0 %v5794_v43  ;;  %v5830_v41 = vpack.c.bf16 %v3942_v39, %v3941_v38  ;;  %v3932_v43 = vld [vmem:[%s6822_s2 + $0xe8] sm:$0xff] }
 0x32e   :  { %5775 = vmatprep.subr.bf16.mxu1 %v5774_v13  ;;  %5799 = vmatprep.subr.bf16.mxu0 %v5798_v14  ;;  %v5818_v44 = vpack.c.bf16 %v3932_v43, %v3931_v42 }
 0x32f   :  { %5211 = vmatprep.mubr.msk.f32.mxu1 %vm284_vm1, %v6459_v20  ;;  %5239 = vmatprep.mubr.msk.f32.mxu0 %vm284_vm1, %v6459_v20 }
 0x330   :  { %5212 = vmatmul.mubr.msk.f32.gmra.mrb[30].mxu1 %vm284_vm1, %v6461_v21  ;;  %5240 = vmatmul.mubr.msk.f32.gmra.mrb[26].mxu0 %vm284_vm1, %v6461_v21 }
 0x331   :  { %5777 = vmatpush3.bf16.msra.mxu1 %v5774_v13  ;;  %5222 = vmatprep.mubr.msk.f32.mxu1 %vm284_vm1, %v6435_v7 }
 0x332   :  { %5801 = vmatpush3.bf16.msra.mxu0 %v5798_v14  ;;  %5264 = vmatprep.mubr.msk.f32.mxu0 %vm284_vm1, %v6435_v7 }
 0x333   :  { %5787 = vmatprep.subr.bf16.mxu1 %v5786_v22  ;;  %5811 = vmatprep.subr.bf16.mxu0 %v5810_v23 }
 0x334   :  { %5223 = vmatmul.mubr.msk.f32.vlgmr.msra.gmra.mrb[32].mxu1 %vm284_vm1, %v6437_v10 }
 0x335   :  { %5265 = vmatmul.mubr.msk.f32.vlgmr.msra.gmra.mrb[28].mxu0 %vm284_vm1, %v6437_v10  ;;  %5225 = vmatprep.mubr.msk.f32.mxu1 %vm284_vm1, %v6459_v20 }
 0x336   :  { %5789 = vmatpush3.bf16.msra.mxu1 %v5786_v22  ;;  %5267 = vmatprep.mubr.msk.f32.mxu0 %vm284_vm1, %v6459_v20 }
 0x337   :  { %5813 = vmatpush3.bf16.msra.mxu0 %v5810_v23  ;;  %5791 = vmatprep.subr.bf16.mxu1 %v5790_v28 }
 0x338   :  { %5226 = vmatmul.mubr.msk.f32.gmra.mrb[34].mxu1 %vm284_vm1, %v6461_v21  ;;  %5815 = vmatprep.subr.bf16.mxu0 %v5814_v29 }
 0x339   :  { %5268 = vmatmul.mubr.msk.f32.gmra.mrb[30].mxu0 %vm284_vm1, %v6461_v21  ;;  %5250 = vmatprep.mubr.msk.f32.mxu1 %vm284_vm1, %v6435_v7 }
 0x33a   :  { %5793 = vmatpush3.bf16.msra.mxu1 %v5790_v28  ;;  %5292 = vmatprep.mubr.msk.f32.mxu0 %vm284_vm1, %v6435_v7 }
 0x33b   :  { %5817 = vmatpush3.bf16.msra.mxu0 %v5814_v29  ;;  %5803 = vmatprep.subr.bf16.mxu1 %v5802_v34 }
 0x33c   :  { %5827 = vmatprep.subr.bf16.mxu0 %v5826_v35 }
 0x33d   :  { %5251 = vmatmul.mubr.msk.f32.vlgmr.msra.gmra.mrb[36].mxu1 %vm284_vm1, %v6437_v10 }
 0x33e   :  { %5293 = vmatmul.mubr.msk.f32.vlgmr.msra.gmra.mrb[32].mxu0 %vm284_vm1, %v6437_v10  ;;  %5253 = vmatprep.mubr.msk.f32.mxu1 %vm284_vm1, %v6459_v20 }
 0x33f   :  { %5805 = vmatpush3.bf16.msra.mxu1 %v5802_v34  ;;  %5295 = vmatprep.mubr.msk.f32.mxu0 %vm284_vm1, %v6459_v20 }
 0x340   :  { %5829 = vmatpush3.bf16.msra.mxu0 %v5826_v35  ;;  %5807 = vmatprep.subr.bf16.mxu1 %v5806_v40 }
 0x341   :  { %5254 = vmatmul.mubr.msk.f32.gmra.mrb[38].mxu1 %vm284_vm1, %v6461_v21  ;;  %5831 = vmatprep.subr.bf16.mxu0 %v5830_v41 }
 0x342   :  { %5296 = vmatmul.mubr.msk.f32.gmra.mrb[34].mxu0 %vm284_vm1, %v6461_v21  ;;  %5278 = vmatprep.mubr.msk.f32.mxu1 %vm284_vm1, %v6435_v7 }
 0x343   :  { %5809 = vmatpush3.bf16.msra.mxu1 %v5806_v40  ;;  %5320 = vmatprep.mubr.msk.f32.mxu0 %vm284_vm1, %v6435_v7 }
 0x344   :  { %5833 = vmatpush3.bf16.msra.mxu0 %v5830_v41  ;;  %5819 = vmatprep.subr.bf16.mxu1 %v5818_v44 }
 0x346   :  { %5279 = vmatmul.mubr.msk.f32.vlgmr.msra.gmra.mrb[40].mxu1 %vm284_vm1, %v6437_v10 }
 0x347   :  { %5321 = vmatmul.mubr.msk.f32.vlgmr.msra.gmra.mrb[36].mxu0 %vm284_vm1, %v6437_v10  ;;  %5281 = vmatprep.mubr.msk.f32.mxu1 %vm284_vm1, %v6459_v20 }
 0x348   :  { %5821 = vmatpush3.bf16.msra.mxu1 %v5818_v44  ;;  %5323 = vmatprep.mubr.msk.f32.mxu0 %vm284_vm1, %v6459_v20 }
 0x349   :  { %5823 = vmatprep.subr.bf16.mxu1 %v5822_v47 }
 0x34a   :  { %5282 = vmatmul.mubr.msk.f32.gmra.mrb[42].mxu1 %vm284_vm1, %v6461_v21 }
 0x34b   :  { %5324 = vmatmul.mubr.msk.f32.gmra.mrb[38].mxu0 %vm284_vm1, %v6461_v21  ;;  %5306 = vmatprep.mubr.msk.f32.mxu1 %vm284_vm1, %v6435_v7 }
 0x34c   :  { %5825 = vmatpush3.bf16.msra.mxu1 %v5822_v47  ;;  %5334 = vmatprep.mubr.msk.f32.mxu0 %vm284_vm1, %v2384_v49 }
 0x34f   :  { %5307 = vmatmul.mubr.msk.f32.vlgmr.msra.gmra.mrb[44].mxu1 %vm284_vm1, %v6437_v10 }
 0x350   :  { %5309 = vmatprep.mubr.msk.f32.mxu1 %vm284_vm1, %v6459_v20 }
 0x353   :  { %5310 = vmatmul.mubr.msk.f32.gmra.mrb[46].mxu1 %vm284_vm1, %v6461_v21 }
 0x354   :  { %2531 = vmatprep.mubr.f32.mxu1 %v2383_v48 }
 0x3ff   :  { %v5210_v50 = vpop.f32.mrb[28].mxu1  ;;  %v5238_v51 = vpop.f32.mrb[24].mxu0 }
 0x400   :  { %1627 = vst.msk [vmem:[#allocation2 + $0x8] sm:$0xff] %vm1625_vm2, %v5210_v50  ;;  %1815 = vst.msk [vmem:[#allocation2 + $0x48] sm:$0xff] %vm1625_vm2, %v5238_v51  ;;  %v1606_v52 = vpop.f32.mrb[29].mxu1  ;;  %v1795_v53 = vpop.f32.mrb[25].mxu0 }
 0x401   :  { %1626 = vst.msk [vmem:[#allocation2] sm:$0xff] %vm1625_vm2, %v1606_v52  ;;  %1814 = vst.msk [vmem:[#allocation2 + $0x40] sm:$0xff] %vm1625_vm2, %v1795_v53 }
 0x403   :  { %v5213_v54 = vpop.f32.mrb[30].mxu1  ;;  %v5241_v55 = vpop.f32.mrb[26].mxu0 }
 0x404   :  { %1629 = vst.msk [vmem:[#allocation2 + $0x18] sm:$0xff] %vm1625_vm2, %v5213_v54  ;;  %1817 = vst.msk [vmem:[#allocation2 + $0x58] sm:$0xff] %vm1625_vm2, %v5241_v55  ;;  %v1616_v57 = vpop.f32.mrb[31].mxu1  ;;  %v1805_v56 = vpop.f32.mrb[27].mxu0 }
 0x405   :  { %1628 = vst.msk [vmem:[#allocation2 + $0x10] sm:$0xff] %vm1625_vm2, %v1616_v57  ;;  %1816 = vst.msk [vmem:[#allocation2 + $0x50] sm:$0xff] %vm1625_vm2, %v1805_v56 }
 0x407   :  { %v5224_v58 = vpop.f32.mrb[32].mxu1  ;;  %v2395_v5 = vld [vmem:[#allocation2 + $0x8] sm:$0xff] }
 0x408   :  { %1721 = vst.msk [vmem:[#allocation2 + $0x28] sm:$0xff] %vm1625_vm2, %v5224_v58  ;;  %v5266_v59 = vpop.f32.mrb[28].mxu0  ;;  %v1701_v60 = vpop.f32.mrb[33].mxu1  ;;  %v2394_v4 = vld [vmem:[#allocation2] sm:$0xff]  ;;  %v2403_v57 = vld [vmem:[#allocation2 + $0x48] sm:$0xff] }
 0x409   :  { %2003 = vst.msk [vmem:[#allocation2 + $0x88] sm:$0xff] %vm1625_vm2, %v5266_v59  ;;  %1720 = vst.msk [vmem:[#allocation2 + $0x20] sm:$0xff] %vm1625_vm2, %v1701_v60  ;;  %v1983_v61 = vpop.f32.mrb[29].mxu0  ;;  %v5836_v11 = vpack.c.bf16 %v2395_v5, %v2394_v4  ;;  %v2402_v55 = vld [vmem:[#allocation2 + $0x40] sm:$0xff]  ;;  %v2387_v59 = vld [vmem:[%s6823_s6 + $0x28] sm:$0xff] }
 0x40a   :  { %2002 = vst.msk [vmem:[#allocation2 + $0x80] sm:$0xff] %vm1625_vm2, %v1983_v61  ;;  %v5852_v60 = vpack.c.bf16 %v2403_v57, %v2402_v55 }
 0x40b   :  { %v5227_v62 = vpop.f32.mrb[34].mxu1  ;;  %v2397_v15 = vld [vmem:[#allocation2 + $0x18] sm:$0xff] }
 0x40c   :  { %1723 = vst.msk [vmem:[#allocation2 + $0x38] sm:$0xff] %vm1625_vm2, %v5227_v62  ;;  %v5269_v63 = vpop.f32.mrb[30].mxu0  ;;  %v1711_v0 = vpop.f32.mrb[35].mxu1  ;;  %v2396_v14 = vld [vmem:[#allocation2 + $0x10] sm:$0xff] }
 0x40d   :  { %2005 = vst.msk [vmem:[#allocation2 + $0x98] sm:$0xff] %vm1625_vm2, %v5269_v63  ;;  %1722 = vst.msk [vmem:[#allocation2 + $0x30] sm:$0xff] %vm1625_vm2, %v1711_v0  ;;  %v1993_v1 = vpop.f32.mrb[31].mxu0  ;;  %v5840_v21 = vpack.c.bf16 %v2397_v15, %v2396_v14  ;;  %v2404_v62 = vld [vmem:[#allocation2 + $0x50] sm:$0xff]  ;;  %v2405_v63 = vld [vmem:[#allocation2 + $0x58] sm:$0xff] }
 0x40e   :  { %2004 = vst.msk [vmem:[#allocation2 + $0x90] sm:$0xff] %vm1625_vm2, %v1993_v1  ;;  %v2386_v14 = vld [vmem:[%s6823_s6 + $0x20] sm:$0xff]  ;;  %v2385_v15 = vld [vmem:[%s6823_s6 + $0x18] sm:$0xff] }
 0x40f   :  { %v2399_v32 = vld [vmem:[#allocation2 + $0x28] sm:$0xff] }
 0x410   :  { %v5252_v2 = vpop.f32.mrb[36].mxu1  ;;  %v2411_v3 = vld [vmem:[#allocation2 + $0x88] sm:$0xff]  ;;  %v2398_v31 = vld [vmem:[#allocation2 + $0x20] sm:$0xff] }
 0x411   :  { %1909 = vst.msk [vmem:[#allocation2 + $0x68] sm:$0xff] %vm1625_vm2, %v5252_v2  ;;  %v5294_v6 = vpop.f32.mrb[32].mxu0  ;;  %v1889_v7 = vpop.f32.mrb[37].mxu1  ;;  %v2410_v8 = vld [vmem:[#allocation2 + $0x80] sm:$0xff]  ;;  %v5844_v40 = vpack.c.bf16 %v2399_v32, %v2398_v31  ;;  %v5856_v2 = vpack.c.bf16 %v2405_v63, %v2404_v62  ;;  %v3989_v62 = vld [vmem:[%s6824_s3 + $0x38] sm:$0xff]  ;;  %v3473_v63 = vld [vmem:[%s6825_s7 + $0x8] sm:$0xff] }
 0x412   :  { %2191 = vst.msk [vmem:[#allocation2 + $0xc8] sm:$0xff] %vm1625_vm2, %v5294_v6  ;;  %1908 = vst.msk [vmem:[#allocation2 + $0x60] sm:$0xff] %vm1625_vm2, %v1889_v7  ;;  %v2171_v9 = vpop.f32.mrb[33].mxu0  ;;  %v5834_v10 = vpack.c.bf16 %v2411_v3, %v2410_v8  ;;  %v2438_v31 = vpop.permute.xlu0 %2437 }
 0x413   :  { %2190 = vst.msk [vmem:[#allocation2 + $0xc0] sm:$0xff] %vm1625_vm2, %v2171_v9  ;;  %v2401_v41 = vld [vmem:[#allocation2 + $0x38] sm:$0xff] }
 0x414   :  { %v5255_v12 = vpop.f32.mrb[38].mxu1  ;;  %5835 = vmatprep.subr.bf16.mxu1 %v5834_v10  ;;  %v2413_v13 = vld [vmem:[#allocation2 + $0x98] sm:$0xff]  ;;  %v2400_v43 = vld [vmem:[#allocation2 + $0x30] sm:$0xff] }
 0x415   :  { %1911 = vst.msk [vmem:[#allocation2 + $0x78] sm:$0xff] %vm1625_vm2, %v5255_v12  ;;  %v5297_v16 = vpop.f32.mrb[34].mxu0  ;;  %v1899_v17 = vpop.f32.mrb[39].mxu1  ;;  %5837 = vmatpush3.bf16.msra.mxu1 %v5836_v11  ;;  %v2412_v18 = vld [vmem:[#allocation2 + $0x90] sm:$0xff]  ;;  %v5848_v53 = vpack.c.bf16 %v2401_v41, %v2400_v43 }
 0x416   :  { %2193 = vst.msk [vmem:[#allocation2 + $0xd8] sm:$0xff] %vm1625_vm2, %v5297_v16  ;;  %1910 = vst.msk [vmem:[#allocation2 + $0x70] sm:$0xff] %vm1625_vm2, %v1899_v17  ;;  %v2181_v19 = vpop.f32.mrb[35].mxu0  ;;  %v5838_v20 = vpack.c.bf16 %v2413_v13, %v2412_v18  ;;  %v2382_v13 = vld [vmem:[%s6823_s6] sm:$0xff]  ;;  %v2389_v16 = vld [vmem:[%s6823_s6 + $0x38] sm:$0xff] }
 0x417   :  { %2192 = vst.msk [vmem:[#allocation2 + $0xd0] sm:$0xff] %vm1625_vm2, %v2181_v19  ;;  %v2388_v17 = vld [vmem:[%s6823_s6 + $0x30] sm:$0xff]  ;;  %v2391_v19 = vld [vmem:[%s6823_s6 + $0x48] sm:$0xff] }
 0x418   :  { %5839 = vmatprep.subr.bf16.mxu1 %v5838_v20  ;;  %v2407_v5 = vld [vmem:[#allocation2 + $0x68] sm:$0xff]  ;;  %v2392_v18 = vld [vmem:[%s6823_s6 + $0x50] sm:$0xff]  ;;  %v2390_v20 = vld [vmem:[%s6823_s6 + $0x40] sm:$0xff] }
 0x419   :  { %v5280_v22 = vpop.f32.mrb[40].mxu1  ;;  %5841 = vmatpush3.bf16.msra.mxu1 %v5840_v21  ;;  %v2419_v44 = vld [vmem:[#allocation2 + $0xc8] sm:$0xff]  ;;  %v2406_v4 = vld [vmem:[#allocation2 + $0x60] sm:$0xff]  ;;  %v2393_v21 = vld [vmem:[%s6823_s6 + $0x58] sm:$0xff] }
 0x41a   :  { %2097 = vst.msk [vmem:[#allocation2 + $0xa8] sm:$0xff] %vm1625_vm2, %v5280_v22  ;;  %v5322_v23 = vpop.f32.mrb[36].mxu0  ;;  %v2077_v24 = vpop.f32.mrb[41].mxu1  ;;  %v2418_v48 = vld [vmem:[#allocation2 + $0xc0] sm:$0xff]  ;;  %v5860_v8 = vpack.c.bf16 %v2407_v5, %v2406_v4 }
 0x41b   :  { %2379 = vst.msk [vmem:[#allocation2 + $0x108] sm:$0xff] %vm1625_vm2, %v5322_v23  ;;  %2096 = vst.msk [vmem:[#allocation2 + $0xa0] sm:$0xff] %vm1625_vm2, %v2077_v24  ;;  %v2359_v25 = vpop.f32.mrb[37].mxu0  ;;  %v5850_v54 = vpack.c.bf16 %v2419_v44, %v2418_v48  ;;  %v2641_v22 = vld [vmem:[%s6824_s3] sm:$0xff]  ;;  %v3959_v24 = vld [vmem:[%s6824_s3 + $0x8] sm:$0xff] }
 0x41c   :  { %2378 = vst.msk [vmem:[#allocation2 + $0x100] sm:$0xff] %vm1625_vm2, %v2359_v25  ;;  %v2409_v11 = vld [vmem:[#allocation2 + $0x78] sm:$0xff]  ;;  %v3974_v23 = vld [vmem:[%s6824_s3 + $0x20] sm:$0xff]  ;;  %v3984_v25 = vld [vmem:[%s6824_s3 + $0x30] sm:$0xff] }
 0x41d   :  { %v5283_v26 = vpop.f32.mrb[42].mxu1  ;;  %v2421_v58 = vld [vmem:[#allocation2 + $0xd8] sm:$0xff]  ;;  %v2408_v10 = vld [vmem:[#allocation2 + $0x70] sm:$0xff]  ;;  %v3994_v48 = vld [vmem:[%s6824_s3 + $0x40] sm:$0xff] }
 0x41e   :  { %2099 = vst.msk [vmem:[#allocation2 + $0xb8] sm:$0xff] %vm1625_vm2, %v5283_v26  ;;  %v5325_v27 = vpop.f32.mrb[38].mxu0  ;;  %v2087_v28 = vpop.f32.mrb[43].mxu1  ;;  %v2420_v56 = vld [vmem:[#allocation2 + $0xd0] sm:$0xff]  ;;  %v5864_v12 = vpack.c.bf16 %v2409_v11, %v2408_v10 }
 0x41f   :  { %2381 = vst.msk [vmem:[#allocation2 + $0x118] sm:$0xff] %vm1625_vm2, %v5325_v27  ;;  %2098 = vst.msk [vmem:[#allocation2 + $0xb0] sm:$0xff] %vm1625_vm2, %v2087_v28  ;;  %v2369_v29 = vpop.f32.mrb[39].mxu0  ;;  %v5854_v61 = vpack.c.bf16 %v2421_v58, %v2420_v56 }
 0x420   :  { %2380 = vst.msk [vmem:[#allocation2 + $0x110] sm:$0xff] %vm1625_vm2, %v2369_v29 }
 0x421   :  { %v2415_v30 = vld [vmem:[#allocation2 + $0xa8] sm:$0xff] }
 0x422   :  { %v5308_v33 = vpop.f32.mrb[44].mxu1  ;;  %v2414_v34 = vld [vmem:[#allocation2 + $0xa0] sm:$0xff]  ;;  %v2427_v35 = vld [vmem:[#allocation2 + $0x108] sm:$0xff] }
 0x423   :  { %2285 = vst.msk [vmem:[#allocation2 + $0xe8] sm:$0xff] %vm1625_vm2, %v5308_v33  ;;  %v2265_v36 = vpop.f32.mrb[45].mxu1  ;;  %v5842_v37 = vpack.c.bf16 %v2415_v30, %v2414_v34  ;;  %v2426_v38 = vld [vmem:[#allocation2 + $0x100] sm:$0xff] }
 0x424   :  { %2284 = vst.msk [vmem:[#allocation2 + $0xe0] sm:$0xff] %vm1625_vm2, %v2265_v36  ;;  %v5866_v39 = vpack.c.bf16 %v2427_v35, %v2426_v38 }
 0x425   :  { %5843 = vmatprep.subr.bf16.mxu1 %v5842_v37  ;;  %v2417_v42 = vld [vmem:[#allocation2 + $0xb8] sm:$0xff]  ;;  %v2443_v37 = vpop.permute.xlu1 %2442 }
 0x426   :  { %v5311_v45 = vpop.f32.mrb[46].mxu1  ;;  %5867 = vmatprep.subr.bf16.mxu0 %v5866_v39  ;;  %5845 = vmatpush3.bf16.msra.mxu1 %v5844_v40  ;;  %v2416_v46 = vld [vmem:[#allocation2 + $0xb0] sm:$0xff]  ;;  %v2429_v47 = vld [vmem:[#allocation2 + $0x118] sm:$0xff] }
 0x427   :  { %2287 = vst.msk [vmem:[#allocation2 + $0xf8] sm:$0xff] %vm1625_vm2, %v5311_v45  ;;  %v2275_v49 = vpop.f32.mrb[47].mxu1  ;;  %5869 = vmatpush3.bf16.msra.mxu0 %v5866_v39  ;;  %v5846_v50 = vpack.c.bf16 %v2417_v42, %v2416_v46  ;;  %v2428_v51 = vld [vmem:[#allocation2 + $0x110] sm:$0xff] }
 0x428   :  { %2286 = vst.msk [vmem:[#allocation2 + $0xf0] sm:$0xff] %vm1625_vm2, %v2275_v49  ;;  %v5870_v52 = vpack.c.bf16 %v2429_v47, %v2428_v51  ;;  %v3964_v47 = vld [vmem:[%s6824_s3 + $0x10] sm:$0xff] }
 0x429   :  { %5847 = vmatprep.subr.bf16.mxu1 %v5846_v50  ;;  %v2448_v50 = vpop.permute.xlu0 %2447  ;;  %v2453_v51 = vpop.permute.xlu1 %2452 }
 0x42a   :  { %5871 = vmatprep.subr.bf16.mxu0 %v5870_v52  ;;  %5849 = vmatpush3.bf16.msra.mxu1 %v5848_v53  ;;  %v2423_v1 = vld [vmem:[#allocation2 + $0xe8] sm:$0xff] }
 0x42b   :  { %5873 = vmatpush3.bf16.msra.mxu0 %v5870_v52  ;;  %5851 = vmatprep.subr.bf16.mxu1 %v5850_v54  ;;  %v2422_v0 = vld [vmem:[#allocation2 + $0xe0] sm:$0xff] }
 0x42c   :  { %v5858_v3 = vpack.c.bf16 %v2423_v1, %v2422_v0  ;;  %5340 = vmatprep.subr.mxu0 %v2641_v22  ;;  %v3474_v0 = vld [vmem:[%s6825_s7 + $0x10] sm:$0xff] }
 0x42e   :  { %5853 = vmatpush3.bf16.msra.mxu1 %v5852_v60  ;;  %5335 = vmatmul.mubr.msk.f32.vlgmr.msra.gmra.mrb[40].mxu0 %vm284_vm1, %v2387_v59  ;;  %v2425_v7 = vld [vmem:[#allocation2 + $0xf8] sm:$0xff] }
 0x42f   :  { %5855 = vmatprep.subr.bf16.mxu1 %v5854_v61  ;;  %v2424_v6 = vld [vmem:[#allocation2 + $0xf0] sm:$0xff]  ;;  %5341 = vmatpush3.msra.mxu0 %v2641_v22  ;;  %v3969_v60 = vld [vmem:[%s6824_s3 + $0x18] sm:$0xff]  ;;  %v3979_v61 = vld [vmem:[%s6824_s3 + $0x28] sm:$0xff] }
 0x430   :  { %v5862_v9 = vpack.c.bf16 %v2425_v7, %v2424_v6  ;;  %5348 = vmatprep.subr.mxu0 %v3959_v24 }
 0x432   :  { %5857 = vmatpush3.bf16.msra.mxu1 %v5856_v2 }
 0x433   :  { %5859 = vmatprep.subr.bf16.mxu1 %v5858_v3 }
 0x436   :  { %5861 = vmatpush3.bf16.msra.mxu1 %v5860_v8 }
 0x437   :  { %5863 = vmatprep.subr.bf16.mxu1 %v5862_v9 }
 0x43a   :  { %5865 = vmatpush3.bf16.msra.mxu1 %v5864_v12 }
 0x43b   :  { %5914 = vmatprep.subr.bf16.mxu1 %v5866_v39 }
 0x43d   :  { %2532 = vmatmul.mubr.f32.vlgmr.msra.gmra.mrb[48].mxu1 %v2382_v13 }
 0x43e   :  { %5916 = vmatpush3.bf16.msra.mxu1 %v5866_v39  ;;  %2536 = vmatprep.mubr.f32.mxu1 %v2386_v14 }
 0x43f   :  { %5915 = vmatprep.subr.bf16.mxu1 %v5870_v52 }
 0x441   :  { %2537 = vmatmul.mubr.f32.gmra.mrb[50].mxu1 %v2385_v15 }
 0x442   :  { %5917 = vmatpush3.bf16.msra.mxu1 %v5870_v52  ;;  %2541 = vmatprep.mubr.f32.mxu1 %v2389_v16 }
 0x443   :  { %5372 = vmatprep.subr.mxu1 %v3974_v23 }
 0x445   :  { %2542 = vmatmul.mubr.f32.gmra.mrb[52].mxu1 %v2388_v17 }
 0x446   :  { %2546 = vmatprep.mubr.f32.mxu1 %v2392_v18 }
 0x449   :  { %2547 = vmatmul.mubr.f32.gmra.mrb[54].mxu1 %v2391_v19 }
 0x44a   :  { %5337 = vmatprep.mubr.msk.f32.mxu1 %vm284_vm1, %v2390_v20 }
 0x44d   :  { %5338 = vmatmul.mubr.msk.f32.vlgmr.msra.gmra.mrb[56].mxu1 %vm284_vm1, %v2393_v21 }
 0x44e   :  { %5373 = vmatpush3.msra.mxu1 %v3974_v23 }
 0x44f   :  { %5388 = vmatprep.subr.mxu1 %v3984_v25 }
 0x501   :  { %v5336_v26 = vpop.f32.mrb[40].mxu0 }
 0x502   :  { %v2618_v27 = vpop.f32.mrb[41].mxu0 }
 0x510   :  { %v4711_v28 = vpop.f32.mrb[48].mxu1 }
 0x511   :  { %v4712_v29 = vpop.f32.mrb[49].mxu1 }
 0x512   :  { %v4713_v30 = vadd.f32 %v4712_v29, %v4711_v28 }
 0x514   :  { %v4714_v32 = vpop.f32.mrb[50].mxu1  ;;  %v2534_v33 = vadd.f32 %v4713_v30, %v2438_v31 }
 0x515   :  { %v4715_v34 = vpop.f32.mrb[51].mxu1 }
 0x516   :  { %v4716_v35 = vadd.f32 %v4715_v34, %v4714_v32  ;;  %v2619_v36 = vadd.f32 %v2618_v27, %v2534_v33 }
 0x518   :  { %v2539_v38 = vadd.f32 %v4716_v35, %v2443_v37  ;;  %v6663_v39 = vmax.f32 %v2619_v36, 0.0  ;;  %v4717_v40 = vpop.f32.mrb[52].mxu1 }
 0x519   :  { %v4718_v41 = vpop.f32.mrb[53].mxu1 }
 0x51a   :  { %v2624_v42 = vadd.f32 %v5336_v26, %v2539_v38  ;;  %v4719_v43 = vadd.f32 %v4718_v41, %v4717_v40  ;;  %5342 = vmatprep.mubr.msk.f32.mxu0 %vm1625_vm2, %v6663_v39  ;;  %5374 = vmatprep.mubr.msk.f32.mxu1 %vm1625_vm2, %v6663_v39 }
 0x51c   :  { %v2638_v44 = vmax.f32 %v2624_v42, 0.0  ;;  %v4720_v45 = vpop.f32.mrb[54].mxu1  ;;  %v2544_v54 = vadd.f32 %v4719_v43, %v2448_v50  ;;  %v3480_v50 = vld [vmem:[%s6825_s7 + $0x40] sm:$0xff] }
 0x51d   :  { %v4721_v46 = vpop.f32.mrb[55].mxu1 }
 0x51e   :  { %v4722_v49 = vadd.f32 %v4721_v46, %v4720_v45  ;;  %5343 = vmatmul.mubr.msk.f32.vlgmr.msra.gmra.mrb[42].mxu0 %vm1625_vm2, %v2638_v44  ;;  %5375 = vmatmul.mubr.msk.f32.vlgmr.msra.gmra.mrb[58].mxu1 %vm1625_vm2, %v2638_v44 }
 0x51f   :  { %5349 = vmatpush3.msra.mxu0 %v3959_v24  ;;  %5389 = vmatpush3.msra.mxu1 %v3984_v25 }
 0x520   :  { %v2549_v52 = vadd.f32 %v4722_v49, %v2453_v51  ;;  %v5339_v53 = vpop.f32.mrb[56].mxu1  ;;  %5356 = vmatprep.subr.mxu0 %v3964_v47  ;;  %5404 = vmatprep.subr.mxu1 %v3994_v48  ;;  %v3477_v49 = vld [vmem:[%s6825_s7 + $0x28] sm:$0xff] }
 0x521   :  { %v2628_v55 = vpop.f32.mrb[57].mxu1 }
 0x522   :  { %v2634_v57 = vadd.f32 %v5339_v53, %v2549_v52  ;;  %v2629_v56 = vadd.f32 %v2628_v55, %v2544_v54  ;;  %v3483_v53 = vld [vmem:[%s6825_s7 + $0x58] sm:$0xff] }
 0x524   :  { %v2640_v58 = vmax.f32 %v2634_v57, 0.0  ;;  %v2639_v59 = vmax.f32 %v2629_v56, 0.0 }
 0x526   :  { %5345 = vmatprep.mubr.msk.f32.mxu0 %vm1625_vm2, %v2639_v59  ;;  %5377 = vmatprep.mubr.msk.f32.mxu1 %vm1625_vm2, %v2639_v59 }
 0x527   :  { %5346 = vmatmul.mubr.msk.f32.gmra.mrb[44].mxu0 %vm1625_vm2, %v2640_v58  ;;  %5378 = vmatmul.mubr.msk.f32.gmra.mrb[60].mxu1 %vm1625_vm2, %v2640_v58 }
 0x528   :  { %5350 = vmatprep.mubr.msk.f32.mxu0 %vm1625_vm2, %v6663_v39  ;;  %5390 = vmatprep.mubr.msk.f32.mxu1 %vm1625_vm2, %v6663_v39 }
 0x52b   :  { %5351 = vmatmul.mubr.msk.f32.vlgmr.msra.gmra.mrb[46].mxu0 %vm1625_vm2, %v2638_v44  ;;  %5391 = vmatmul.mubr.msk.f32.vlgmr.msra.gmra.mrb[62].mxu1 %vm1625_vm2, %v2638_v44 }
 0x52c   :  { %5353 = vmatprep.mubr.msk.f32.mxu0 %vm1625_vm2, %v2639_v59  ;;  %5357 = vmatpush3.msra.mxu0 %v3964_v47 }
 0x52d   :  { %5393 = vmatprep.mubr.msk.f32.mxu1 %vm1625_vm2, %v2639_v59  ;;  %5405 = vmatpush3.msra.mxu1 %v3994_v48 }
 0x52e   :  { %5364 = vmatprep.subr.mxu0 %v3969_v60 }
 0x52f   :  { %5354 = vmatmul.mubr.msk.f32.gmra.mrb[48].mxu0 %vm1625_vm2, %v2640_v58  ;;  %5394 = vmatmul.mubr.msk.f32.gmra.mrb[64].mxu1 %vm1625_vm2, %v2640_v58 }
 0x530   :  { %5358 = vmatprep.mubr.msk.f32.mxu0 %vm1625_vm2, %v6663_v39  ;;  %5406 = vmatprep.mubr.msk.f32.mxu1 %vm1625_vm2, %v6663_v39 }
 0x533   :  { %5359 = vmatmul.mubr.msk.f32.vlgmr.msra.gmra.mrb[50].mxu0 %vm1625_vm2, %v2638_v44  ;;  %5407 = vmatmul.mubr.msk.f32.vlgmr.msra.gmra.mrb[66].mxu1 %vm1625_vm2, %v2638_v44 }
 0x534   :  { %5361 = vmatprep.mubr.msk.f32.mxu0 %vm1625_vm2, %v2639_v59  ;;  %5365 = vmatpush3.msra.mxu0 %v3969_v60 }
 0x535   :  { %5409 = vmatprep.mubr.msk.f32.mxu1 %vm1625_vm2, %v2639_v59  ;;  %5380 = vmatprep.subr.mxu0 %v3979_v61 }
 0x537   :  { %5362 = vmatmul.mubr.msk.f32.gmra.mrb[52].mxu0 %vm1625_vm2, %v2640_v58  ;;  %5410 = vmatmul.mubr.msk.f32.gmra.mrb[68].mxu1 %vm1625_vm2, %v2640_v58 }
 0x538   :  { %5366 = vmatprep.mubr.msk.f32.mxu0 %vm1625_vm2, %v6663_v39  ;;  %5420 = vmatprep.mubr.msk.f32.mxu1 %vm284_vm1, %v3474_v0 }
 0x53b   :  { %5367 = vmatmul.mubr.msk.f32.vlgmr.msra.gmra.mrb[54].mxu0 %vm1625_vm2, %v2638_v44 }
 0x53c   :  { %5369 = vmatprep.mubr.msk.f32.mxu0 %vm1625_vm2, %v2639_v59  ;;  %5381 = vmatpush3.msra.mxu0 %v3979_v61 }
 0x53d   :  { %5396 = vmatprep.subr.mxu0 %v3989_v62 }
 0x53f   :  { %5370 = vmatmul.mubr.msk.f32.gmra.mrb[56].mxu0 %vm1625_vm2, %v2640_v58 }
 0x540   :  { %5382 = vmatprep.mubr.msk.f32.mxu0 %vm1625_vm2, %v6663_v39 }
 0x543   :  { %5383 = vmatmul.mubr.msk.f32.vlgmr.msra.gmra.mrb[58].mxu0 %vm1625_vm2, %v2638_v44 }
 0x544   :  { %5385 = vmatprep.mubr.msk.f32.mxu0 %vm1625_vm2, %v2639_v59  ;;  %5397 = vmatpush3.msra.mxu0 %v3989_v62 }
 0x547   :  { %5386 = vmatmul.mubr.msk.f32.gmra.mrb[60].mxu0 %vm1625_vm2, %v2640_v58 }
 0x548   :  { %5398 = vmatprep.mubr.msk.f32.mxu0 %vm1625_vm2, %v6663_v39 }
 0x54b   :  { %5399 = vmatmul.mubr.msk.f32.vlgmr.msra.gmra.mrb[62].mxu0 %vm1625_vm2, %v2638_v44 }
 0x54c   :  { %5401 = vmatprep.mubr.msk.f32.mxu0 %vm1625_vm2, %v2639_v59 }
 0x54f   :  { %5402 = vmatmul.mubr.msk.f32.gmra.mrb[64].mxu0 %vm1625_vm2, %v2640_v58 }
 0x550   :  { %3621 = vmatprep.mubr.f32.mxu0 %v3473_v63 }
 0x5f1   :  { %v5344_v1 = vpop.f32.mrb[42].mxu0  ;;  %v5376_v2 = vpop.f32.mrb[58].mxu1 }
 0x5f2   :  { %2741 = vst.msk [vmem:[#allocation2 + $0x8] sm:$0xff] %vm2739_vm3, %v5344_v1  ;;  %3105 = vst.msk [vmem:[#allocation2 + $0x88] sm:$0xff] %vm2739_vm3, %v5376_v2  ;;  %v2720_v3 = vpop.f32.mrb[43].mxu0  ;;  %v3085_v4 = vpop.f32.mrb[59].mxu1 }
 0x5f3   :  { %2740 = vst.msk [vmem:[#allocation2] sm:$0xff] %vm2739_vm3, %v2720_v3  ;;  %3104 = vst.msk [vmem:[#allocation2 + $0x80] sm:$0xff] %vm2739_vm3, %v3085_v4 }
 0x5f9   :  { %v3501_v5 = vld [vmem:[#allocation2 + $0x88] sm:$0xff] }
 0x5fa   :  { %v3485_v6 = vld [vmem:[#allocation2 + $0x8] sm:$0xff]  ;;  %v5347_v7 = vpop.f32.mrb[44].mxu0  ;;  %v5379_v8 = vpop.f32.mrb[60].mxu1  ;;  %v3500_v9 = vld [vmem:[#allocation2 + $0x80] sm:$0xff] }
 0x5fb   :  { %v3484_v10 = vld [vmem:[#allocation2] sm:$0xff]  ;;  %2743 = vst.msk [vmem:[#allocation2 + $0x18] sm:$0xff] %vm2739_vm3, %v5347_v7  ;;  %3107 = vst.msk [vmem:[#allocation2 + $0x98] sm:$0xff] %vm2739_vm3, %v5379_v8  ;;  %v2730_v11 = vpop.f32.mrb[45].mxu0  ;;  %v3095_v12 = vpop.f32.mrb[61].mxu1  ;;  %v5874_v13 = vpack.c.bf16 %v3501_v5, %v3500_v9 }
 0x5fc   :  { %v5876_v14 = vpack.c.bf16 %v3485_v6, %v3484_v10  ;;  %2742 = vst.msk [vmem:[#allocation2 + $0x10] sm:$0xff] %vm2739_vm3, %v2730_v11  ;;  %3106 = vst.msk [vmem:[#allocation2 + $0x90] sm:$0xff] %vm2739_vm3, %v3095_v12 }
 0x5fd   :  { %5875 = vmatprep.subr.bf16.mxu0 %v5874_v13 }
 0x5fe   :  { %v5352_v15 = vpop.f32.mrb[46].mxu0  ;;  %v5392_v16 = vpop.f32.mrb[62].mxu1  ;;  %5877 = vmatpush3.bf16.msra.mxu0 %v5876_v14 }
 0x5ff   :  { %2832 = vst.msk [vmem:[#allocation2 + $0x28] sm:$0xff] %vm2739_vm3, %v5352_v15  ;;  %3287 = vst.msk [vmem:[#allocation2 + $0xc8] sm:$0xff] %vm2739_vm3, %v5392_v16  ;;  %v2812_v17 = vpop.f32.mrb[47].mxu0  ;;  %v3267_v18 = vpop.f32.mrb[63].mxu1 }
 0x600   :  { %2831 = vst.msk [vmem:[#allocation2 + $0x20] sm:$0xff] %vm2739_vm3, %v2812_v17  ;;  %3286 = vst.msk [vmem:[#allocation2 + $0xc0] sm:$0xff] %vm2739_vm3, %v3267_v18 }
 0x602   :  { %v5355_v19 = vpop.f32.mrb[48].mxu0  ;;  %v5395_v20 = vpop.f32.mrb[64].mxu1  ;;  %v3503_v21 = vld [vmem:[#allocation2 + $0x98] sm:$0xff] }
 0x603   :  { %v3487_v22 = vld [vmem:[#allocation2 + $0x18] sm:$0xff]  ;;  %2834 = vst.msk [vmem:[#allocation2 + $0x38] sm:$0xff] %vm2739_vm3, %v5355_v19  ;;  %3289 = vst.msk [vmem:[#allocation2 + $0xd8] sm:$0xff] %vm2739_vm3, %v5395_v20  ;;  %v2822_v23 = vpop.f32.mrb[49].mxu0  ;;  %v3277_v24 = vpop.f32.mrb[65].mxu1  ;;  %v3502_v25 = vld [vmem:[#allocation2 + $0x90] sm:$0xff] }
 0x604   :  { %v3486_v26 = vld [vmem:[#allocation2 + $0x10] sm:$0xff]  ;;  %2833 = vst.msk [vmem:[#allocation2 + $0x30] sm:$0xff] %vm2739_vm3, %v2822_v23  ;;  %3288 = vst.msk [vmem:[#allocation2 + $0xd0] sm:$0xff] %vm2739_vm3, %v3277_v24  ;;  %v5878_v27 = vpack.c.bf16 %v3503_v21, %v3502_v25 }
 0x605   :  { %v5880_v28 = vpack.c.bf16 %v3487_v22, %v3486_v26 }
 0x606   :  { %v5360_v29 = vpop.f32.mrb[50].mxu0  ;;  %v5408_v30 = vpop.f32.mrb[66].mxu1  ;;  %5879 = vmatprep.subr.bf16.mxu0 %v5878_v27  ;;  %v3489_v56 = vld [vmem:[#allocation2 + $0x28] sm:$0xff] }
 0x607   :  { %2923 = vst.msk [vmem:[#allocation2 + $0x48] sm:$0xff] %vm2739_vm3, %v5360_v29  ;;  %3469 = vst.msk [vmem:[#allocation2 + $0x108] sm:$0xff] %vm2739_vm3, %v5408_v30  ;;  %v2903_v31 = vpop.f32.mrb[51].mxu0  ;;  %v3449_v32 = vpop.f32.mrb[67].mxu1  ;;  %5881 = vmatpush3.bf16.msra.mxu0 %v5880_v28  ;;  %v3488_v57 = vld [vmem:[#allocation2 + $0x20] sm:$0xff]  ;;  %v3509_v5 = vld [vmem:[#allocation2 + $0xc8] sm:$0xff] }
 0x608   :  { %2922 = vst.msk [vmem:[#allocation2 + $0x40] sm:$0xff] %vm2739_vm3, %v2903_v31  ;;  %3468 = vst.msk [vmem:[#allocation2 + $0x100] sm:$0xff] %vm2739_vm3, %v3449_v32  ;;  %v5884_v61 = vpack.c.bf16 %v3489_v56, %v3488_v57  ;;  %v3508_v4 = vld [vmem:[#allocation2 + $0xc0] sm:$0xff]  ;;  %v3475_v32 = vld [vmem:[%s6825_s7 + $0x18] sm:$0xff] }
 0x609   :  { %v5890_v8 = vpack.c.bf16 %v3509_v5, %v3508_v4  ;;  %v3472_v30 = vld [vmem:[%s6825_s7] sm:$0xff] }
 0x60a   :  { %v5363_v33 = vpop.f32.mrb[52].mxu0  ;;  %v5411_v34 = vpop.f32.mrb[68].mxu1  ;;  %v3491_v1 = vld [vmem:[#allocation2 + $0x38] sm:$0xff]  ;;  %v3476_v31 = vld [vmem:[%s6825_s7 + $0x20] sm:$0xff] }
 0x60b   :  { %2925 = vst.msk [vmem:[#allocation2 + $0x58] sm:$0xff] %vm2739_vm3, %v5363_v33  ;;  %3471 = vst.msk [vmem:[#allocation2 + $0x118] sm:$0xff] %vm2739_vm3, %v5411_v34  ;;  %v2913_v35 = vpop.f32.mrb[53].mxu0  ;;  %v3459_v36 = vpop.f32.mrb[69].mxu1  ;;  %v3490_v0 = vld [vmem:[#allocation2 + $0x30] sm:$0xff]  ;;  %v3511_v12 = vld [vmem:[#allocation2 + $0xd8] sm:$0xff] }
 0x60c   :  { %2924 = vst.msk [vmem:[#allocation2 + $0x50] sm:$0xff] %vm2739_vm3, %v2913_v35  ;;  %3470 = vst.msk [vmem:[#allocation2 + $0x110] sm:$0xff] %vm2739_vm3, %v3459_v36  ;;  %v5888_v7 = vpack.c.bf16 %v3491_v1, %v3490_v0  ;;  %v3510_v11 = vld [vmem:[#allocation2 + $0xd0] sm:$0xff]  ;;  %v3479_v33 = vld [vmem:[%s6825_s7 + $0x38] sm:$0xff] }
 0x60d   :  { %v5894_v14 = vpack.c.bf16 %v3511_v12, %v3510_v11  ;;  %v3478_v34 = vld [vmem:[%s6825_s7 + $0x30] sm:$0xff]  ;;  %v3481_v36 = vld [vmem:[%s6825_s7 + $0x48] sm:$0xff] }
 0x60e   :  { %v5368_v37 = vpop.f32.mrb[54].mxu0  ;;  %v3517_v38 = vld [vmem:[#allocation2 + $0x108] sm:$0xff]  ;;  %v3482_v35 = vld [vmem:[%s6825_s7 + $0x50] sm:$0xff] }
 0x60f   :  { %3014 = vst.msk [vmem:[#allocation2 + $0x68] sm:$0xff] %vm2739_vm3, %v5368_v37  ;;  %v2994_v39 = vpop.f32.mrb[55].mxu0  ;;  %v3516_v40 = vld [vmem:[#allocation2 + $0x100] sm:$0xff]  ;;  %v3493_v10 = vld [vmem:[#allocation2 + $0x48] sm:$0xff] }
 0x610   :  { %3013 = vst.msk [vmem:[#allocation2 + $0x60] sm:$0xff] %vm2739_vm3, %v2994_v39  ;;  %v5906_v41 = vpack.c.bf16 %v3517_v38, %v3516_v40  ;;  %v3492_v9 = vld [vmem:[#allocation2 + $0x40] sm:$0xff] }
 0x611   :  { %v5892_v13 = vpack.c.bf16 %v3493_v10, %v3492_v9 }
 0x612   :  { %v5371_v42 = vpop.f32.mrb[56].mxu0  ;;  %5907 = vmatprep.subr.bf16.mxu1 %v5906_v41  ;;  %v3519_v43 = vld [vmem:[#allocation2 + $0x118] sm:$0xff] }
 0x613   :  { %3016 = vst.msk [vmem:[#allocation2 + $0x78] sm:$0xff] %vm2739_vm3, %v5371_v42  ;;  %v3004_v44 = vpop.f32.mrb[57].mxu0  ;;  %5909 = vmatpush3.bf16.msra.mxu1 %v5906_v41  ;;  %v3518_v45 = vld [vmem:[#allocation2 + $0x110] sm:$0xff]  ;;  %v3495_v16 = vld [vmem:[#allocation2 + $0x58] sm:$0xff] }
 0x614   :  { %3015 = vst.msk [vmem:[#allocation2 + $0x70] sm:$0xff] %vm2739_vm3, %v3004_v44  ;;  %v5910_v46 = vpack.c.bf16 %v3519_v43, %v3518_v45  ;;  %v3494_v15 = vld [vmem:[#allocation2 + $0x50] sm:$0xff]  ;;  %v3528_v44 = vpop.permute.xlu0 %3527 }
 0x615   :  { %v5896_v19 = vpack.c.bf16 %v3495_v16, %v3494_v15 }
 0x616   :  { %v5384_v47 = vpop.f32.mrb[58].mxu0  ;;  %5911 = vmatprep.subr.bf16.mxu1 %v5910_v46  ;;  %v3497_v22 = vld [vmem:[#allocation2 + $0x68] sm:$0xff] }
 0x617   :  { %3196 = vst.msk [vmem:[#allocation2 + $0xa8] sm:$0xff] %vm2739_vm3, %v5384_v47  ;;  %v3176_v48 = vpop.f32.mrb[59].mxu0  ;;  %5913 = vmatpush3.bf16.msra.mxu1 %v5910_v46  ;;  %v3496_v21 = vld [vmem:[#allocation2 + $0x60] sm:$0xff] }
 0x618   :  { %3195 = vst.msk [vmem:[#allocation2 + $0xa0] sm:$0xff] %vm2739_vm3, %v3176_v48  ;;  %v5900_v25 = vpack.c.bf16 %v3497_v22, %v3496_v21  ;;  %v3538_v56 = vpop.permute.xlu0 %3537 }
 0x61a   :  { %v5387_v51 = vpop.f32.mrb[60].mxu0  ;;  %5421 = vmatmul.mubr.msk.f32.vlgmr.msra.gmra.mrb[70].mxu1 %vm284_vm1, %v3477_v49  ;;  %v3499_v28 = vld [vmem:[#allocation2 + $0x78] sm:$0xff] }
 0x61b   :  { %3198 = vst.msk [vmem:[#allocation2 + $0xb8] sm:$0xff] %vm2739_vm3, %v5387_v51  ;;  %v3186_v52 = vpop.f32.mrb[61].mxu0  ;;  %5423 = vmatprep.mubr.msk.f32.mxu1 %vm284_vm1, %v3480_v50  ;;  %v3498_v27 = vld [vmem:[#allocation2 + $0x70] sm:$0xff]  ;;  %v3533_v50 = vpop.permute.xlu1 %3532 }
 0x61c   :  { %3197 = vst.msk [vmem:[#allocation2 + $0xb0] sm:$0xff] %vm2739_vm3, %v3186_v52  ;;  %v5904_v29 = vpack.c.bf16 %v3499_v28, %v3498_v27 }
 0x61e   :  { %v5400_v54 = vpop.f32.mrb[62].mxu0  ;;  %v3505_v55 = vld [vmem:[#allocation2 + $0xa8] sm:$0xff]  ;;  %5424 = vmatmul.mubr.msk.f32.gmra.mrb[72].mxu1 %vm284_vm1, %v3483_v53 }
 0x61f   :  { %3378 = vst.msk [vmem:[#allocation2 + $0xe8] sm:$0xff] %vm2739_vm3, %v5400_v54  ;;  %v3358_v58 = vpop.f32.mrb[63].mxu0  ;;  %v3504_v59 = vld [vmem:[#allocation2 + $0xa0] sm:$0xff]  ;;  %v3543_v0 = vpop.permute.xlu1 %3542 }
 0x620   :  { %3377 = vst.msk [vmem:[#allocation2 + $0xe0] sm:$0xff] %vm2739_vm3, %v3358_v58  ;;  %v5882_v60 = vpack.c.bf16 %v3505_v55, %v3504_v59 }
 0x622   :  { %v5403_v62 = vpop.f32.mrb[64].mxu0  ;;  %5883 = vmatprep.subr.bf16.mxu0 %v5882_v60  ;;  %v3507_v63 = vld [vmem:[#allocation2 + $0xb8] sm:$0xff] }
 0x623   :  { %3380 = vst.msk [vmem:[#allocation2 + $0xf8] sm:$0xff] %vm2739_vm3, %v5403_v62  ;;  %v3368_v2 = vpop.f32.mrb[65].mxu0  ;;  %5885 = vmatpush3.bf16.msra.mxu0 %v5884_v61  ;;  %v3506_v3 = vld [vmem:[#allocation2 + $0xb0] sm:$0xff] }
 0x624   :  { %3379 = vst.msk [vmem:[#allocation2 + $0xf0] sm:$0xff] %vm2739_vm3, %v3368_v2  ;;  %v5886_v6 = vpack.c.bf16 %v3507_v63, %v3506_v3 }
 0x626   :  { %5887 = vmatprep.subr.bf16.mxu0 %v5886_v6  ;;  %v3513_v18 = vld [vmem:[#allocation2 + $0xe8] sm:$0xff] }
 0x627   :  { %5889 = vmatpush3.bf16.msra.mxu0 %v5888_v7  ;;  %v3512_v17 = vld [vmem:[#allocation2 + $0xe0] sm:$0xff] }
 0x628   :  { %5891 = vmatprep.subr.bf16.mxu0 %v5890_v8  ;;  %v5898_v20 = vpack.c.bf16 %v3513_v18, %v3512_v17 }
 0x62a   :  { %v3515_v24 = vld [vmem:[#allocation2 + $0xf8] sm:$0xff] }
 0x62b   :  { %5893 = vmatpush3.bf16.msra.mxu0 %v5892_v13  ;;  %v3514_v23 = vld [vmem:[#allocation2 + $0xf0] sm:$0xff] }
 0x62c   :  { %5895 = vmatprep.subr.bf16.mxu0 %v5894_v14  ;;  %v5902_v26 = vpack.c.bf16 %v3515_v24, %v3514_v23 }
 0x62f   :  { %5897 = vmatpush3.bf16.msra.mxu0 %v5896_v19 }
 0x630   :  { %5899 = vmatprep.subr.bf16.mxu0 %v5898_v20 }
 0x633   :  { %5901 = vmatpush3.bf16.msra.mxu0 %v5900_v25 }
 0x634   :  { %5903 = vmatprep.subr.bf16.mxu0 %v5902_v26 }
 0x637   :  { %5905 = vmatpush3.bf16.msra.mxu0 %v5904_v29 }
 0x63a   :  { %3622 = vmatmul.mubr.f32.vlgmr.msra.gmra.mrb[66].mxu0 %v3472_v30 }
 0x63b   :  { %3626 = vmatprep.mubr.f32.mxu0 %v3476_v31 }
 0x63e   :  { %3627 = vmatmul.mubr.f32.gmra.mrb[68].mxu0 %v3475_v32 }
 0x63f   :  { %3631 = vmatprep.mubr.f32.mxu0 %v3479_v33 }
 0x642   :  { %3632 = vmatmul.mubr.f32.gmra.mrb[70].mxu0 %v3478_v34 }
 0x643   :  { %3636 = vmatprep.mubr.f32.mxu0 %v3482_v35 }
 0x646   :  { %3637 = vmatmul.mubr.f32.gmra.mrb[72].mxu0 %v3481_v36 }
 0x6ed   :  { %v5422_v37 = vpop.f32.mrb[70].mxu1 }
 0x6ee   :  { %v3708_v38 = vpop.f32.mrb[71].mxu1 }
 0x6f1   :  { %v5425_v39 = vpop.f32.mrb[72].mxu1 }
 0x6f2   :  { %v3718_v40 = vpop.f32.mrb[73].mxu1 }
 0x70d   :  { %v4808_v41 = vpop.f32.mrb[66].mxu0 }
 0x70e   :  { %v4809_v42 = vpop.f32.mrb[67].mxu0 }
 0x70f   :  { %v4810_v43 = vadd.f32 %v4809_v42, %v4808_v41 }
 0x711   :  { %v4811_v45 = vpop.f32.mrb[68].mxu0  ;;  %v3624_v46 = vadd.f32 %v4810_v43, %v3528_v44 }
 0x712   :  { %v4812_v47 = vpop.f32.mrb[69].mxu0 }
 0x713   :  { %v4813_v48 = vadd.f32 %v4812_v47, %v4811_v45  ;;  %v3709_v49 = vadd.f32 %v3708_v38, %v3624_v46 }
 0x715   :  { %v3629_v51 = vadd.f32 %v4813_v48, %v3533_v50  ;;  %v3727_v52 = vmax.f32 %v3709_v49, 0.0  ;;  %v4814_v53 = vpop.f32.mrb[70].mxu0 }
 0x716   :  { %v4815_v54 = vpop.f32.mrb[71].mxu0 }
 0x717   :  { %v3714_v55 = vadd.f32 %v5422_v37, %v3629_v51  ;;  %3731 = vst.msk [vmem:[%s6826_s9] sm:$0xff] %vm2739_vm3, %v3727_v52  ;;  %v4816_v57 = vadd.f32 %v4815_v54, %v4814_v53 }
 0x719   :  { %v3728_v58 = vmax.f32 %v3714_v55, 0.0  ;;  %v4817_v59 = vpop.f32.mrb[72].mxu0  ;;  %v3634_v60 = vadd.f32 %v4816_v57, %v3538_v56 }
 0x71a   :  { %v4818_v61 = vpop.f32.mrb[73].mxu0 }
 0x71b   :  { %3732 = vst.msk [vmem:[%s6826_s9 + $0x8] sm:$0xff] %vm2739_vm3, %v3728_v58  ;;  %v4819_v62 = vadd.f32 %v4818_v61, %v4817_v59  ;;  %v3719_v63 = vadd.f32 %v3718_v40, %v3634_v60 }
 0x71d   :  { %v3639_v1 = vadd.f32 %v4819_v62, %v3543_v0  ;;  %v3729_v2 = vmax.f32 %v3719_v63, 0.0 }
 0x71f   :  { %v3724_v3 = vadd.f32 %v5425_v39, %v3639_v1  ;;  %3733 = vst.msk [vmem:[%s6826_s9 + $0x10] sm:$0xff] %vm2739_vm3, %v3729_v2 }
 0x721   :  { %v3730_v4 = vmax.f32 %v3724_v3, 0.0 }
 0x723   :  { %3734 = vst.msk [vmem:[%s6826_s9 + $0x18] sm:$0xff] %vm2739_vm3, %v3730_v4 }

</bundles_post_ra>
